<compile_context>
chip_gen: v7x
topology: tpu7x:2x2x1
jax: 0.10.0
libtpu: 0.0.40
codegen_flags: <defaults>
</compile_context>

<pallas_src>
import functools
import math

import jax
import jax.numpy as jnp
from jax.experimental import pallas as pl
from jax.experimental.pallas import tpu as pltpu

_LANES = 128


def _round_up(x, m):
    return (x + m - 1) // m * m


# ----------------------------- Pallas kernel --------------------------------
def _critic_gnn_kernel(x1_ref, x2_ref, a_ref, w_ref, out_ref, *,
                       offs, embedding_size, n_neighbors):
    """One batch tile of the Critic_GNN forward.

    x1_ref : (Bt, 2*input_size)             cat(s[:, 0, :], s[:, 1, :])
    x2_ref : (n_neighbors, Bt, input_size)  neighbors, neighbor-major
    a_ref  : (Bt, action_dim)
    w_ref  : (rows, 128) packed, pre-transposed weight slab (see pack_params)
    out_ref: (Bt, 128) lane-dense output; real result lives in cols [:out]
    """
    f32 = jnp.float32

    def w(name):
        o, r, c = offs[name]            # static python ints -> free ref slices
        return w_ref[o:o + r, :c]

    # ---- self branch (mean over a single row is the identity -> dropped) ----
    h1 = jnp.maximum(
        jnp.dot(x1_ref[...], w("se1_w"), preferred_element_type=f32)
        + w("se1_b"), 0.0)
    e1 = jnp.dot(h1, w("se2_w"), preferred_element_type=f32) + w("se2_b")

    # ---- neighbor branch: mean folded in front of the second linear ----
    ne1_w = w("ne1_w")
    ne1_b = w("ne1_b")

    def nb(j):  # (Bt, input_size) @ (input_size, 32)
        return jnp.maximum(
            jnp.dot(x2_ref[j], ne1_w, preferred_element_type=f32) + ne1_b, 0.0)

    acc = nb(0)
    for j in range(1, n_neighbors):      # small static unroll
        acc = acc + nb(j)
    e2 = (jnp.dot(acc * (1.0 / n_neighbors), w("ne2_w"),
                  preferred_element_type=f32) + w("ne2_b"))

    # ---- head: linear1(cat([e1, e2, a])) via split weights (no concat) ----
    o, r, c = offs["l1_w"]
    emb = embedding_size
    z = (jnp.dot(e1, w_ref[o:o + emb, :c], preferred_element_type=f32)
         + jnp.dot(e2, w_ref[o + emb:o + 2 * emb, :c],
                   preferred_element_type=f32)
         + jnp.dot(a_ref[...], w_ref[o + 2 * emb:o + r, :c],
                   preferred_element_type=f32)
         + w("l1_b"))
    z = jnp.maximum(z, 0.0)
    z = jnp.maximum(
        jnp.dot(z, w("l2_w"), preferred_element_type=f32) + w("l2_b"), 0.0)

    # l3 weight/bias are zero-padded to 128 lanes -> full unmasked store.
    out_ref[...] = (jnp.dot(z, w("l3_w"), preferred_element_type=f32)
                    + w("l3_b"))


# ------------------------- one-time parameter packing ------------------------
def pack_params(params, *, output_size):
    """One-time prep: transpose every Linear weight to (in, out), zero-pad to
    128 lanes, 8-align row offsets, stack into a single f32 slab."""
    assert output_size <= _LANES

    def wt(x):
        return jnp.asarray(x, jnp.float32).T

    def b2(x):
        return jnp.asarray(x, jnp.float32).reshape(1, -1)

    entries = [
        ("se1_w", wt(params["se1_w"])), ("se1_b", b2(params["se1_b"])),
        ("se2_w", wt(params["se2_w"])), ("se2_b", b2(params["se2_b"])),
        ("ne1_w", wt(params["ne1_w"])), ("ne1_b", b2(params["ne1_b"])),
        ("ne2_w", wt(params["ne2_w"])), ("ne2_b", b2(params["ne2_b"])),
        ("l1_w", wt(params["l1_w"])), ("l1_b", b2(params["l1_b"])),
        ("l2_w", wt(params["l2_w"])), ("l2_b", b2(params["l2_b"])),
        # l3 padded to the full lane width so the output store is unmasked.
        ("l3_w", jnp.pad(wt(params["l3_w"]),
                         ((0, 0), (0, _LANES - output_size)))),
        ("l3_b", jnp.pad(b2(params["l3_b"]),
                         ((0, 0), (0, _LANES - output_size)))),
    ]

    offs = {}
    chunks = []
    row = 0
    for name, arr in entries:
        r, c = arr.shape
        offs[name] = (row, r, c)
        chunk = jnp.pad(arr, ((0, _round_up(r, 8) - r), (0, _LANES - c)))
        chunks.append(chunk)
        row += chunk.shape[0]
    slab = jnp.concatenate(chunks, axis=0)     # (rows, 128) f32
    return slab, offs


# ------------------------------ wrappers --------------------------------------
def critic_gnn_forward_batched(s, a, slab, offs, *, input_size, embedding_size,
                               action_dim, output_size, block_b=128):
    """Batched Critic_GNN.forward: s (B, n_agents, in), a (B, act) -> (B, out)."""
    B, n_agents, d = s.shape
    assert d == input_size and a.shape == (B, action_dim)
    assert n_agents >= 3, "need >=1 neighbor (torch reference NaNs otherwise)"
    n_nbr = n_agents - 2

    s = s.astype(jnp.float32)
    a = a.astype(jnp.float32)

    bp = pl.cdiv(B, block_b) * block_b
    if bp != B:
        s = jnp.pad(s, ((0, bp - B), (0, 0), (0, 0)))
        a = jnp.pad(a, ((0, bp - B), (0, 0)))

    x1 = s[:, :2, :].reshape(bp, 2 * input_size)     # == cat(s[:,0], s[:,1])
    x2 = jnp.transpose(s[:, 2:, :], (1, 0, 2))       # (n_nbr, bp, input_size)

    rows = slab.shape[0]
    kernel = functools.partial(
        _critic_gnn_kernel, offs=offs, embedding_size=embedding_size,
        n_neighbors=n_nbr)

    out = pl.pallas_call(
        kernel,
        out_shape=jax.ShapeDtypeStruct((bp, _LANES), jnp.float32),
        grid=(bp // block_b,),
        in_specs=[
            pl.BlockSpec((block_b, 2 * input_size), lambda i: (i, 0)),
            pl.BlockSpec((n_nbr, block_b, input_size), lambda i: (0, i, 0)),
            pl.BlockSpec((block_b, action_dim), lambda i: (i, 0)),
            pl.BlockSpec((rows, _LANES), lambda i: (0, 0)),  # resident weights
        ],
        out_specs=pl.BlockSpec((block_b, _LANES), lambda i: (i, 0)),
        compiler_params=pltpu.CompilerParams(
            dimension_semantics=("parallel",)),
    )(x1, x2, a, slab)
    return out[:B, :output_size]


def critic_gnn_forward(s, a, slab, offs, **dims):
    """Single-sample forward matching the original torch module signature."""
    return critic_gnn_forward_batched(s[None], a[None], slab, offs, **dims)[0]


# ------------------------- deterministic param init --------------------------
def init_params(key, input_size, embedding_size, action_dim, output_size):
    """PyTorch-Linear-style uniform(-1/sqrt(fan_in), 1/sqrt(fan_in)) init."""
    shapes = {
        "se1": (32, input_size * 2),
        "se2": (embedding_size, 32),
        "ne1": (32, input_size),
        "ne2": (embedding_size, 32),
        "l1": (64, embedding_size * 2 + action_dim),
        "l2": (16, 64),
        "l3": (output_size, 16),
    }
    params = {}
    for name, (out_f, in_f) in shapes.items():
        key, kw, kb = jax.random.split(key, 3)
        bound = 1.0 / math.sqrt(in_f)
        params[f"{name}_w"] = jax.random.uniform(
            kw, (out_f, in_f), jnp.float32, -bound, bound)
        params[f"{name}_b"] = jax.random.uniform(
            kb, (out_f,), jnp.float32, -bound, bound)
    return params


# ------------------------------ reference ------------------------------------
def reference_forward_single(s, a, params):
    def lin(x, w, b):
        return x @ w.T + b
    x1 = jnp.concatenate([s[0:1, :], s[1:2, :]], axis=-1)
    x2 = s[2:, :]
    x1 = jax.nn.relu(lin(x1, params["se1_w"], params["se1_b"]))
    x1 = jnp.mean(lin(x1, params["se2_w"], params["se2_b"]), axis=0)
    x2 = jax.nn.relu(lin(x2, params["ne1_w"], params["ne1_b"]))
    x2 = jnp.mean(lin(x2, params["ne2_w"], params["ne2_b"]), axis=0)
    x = jnp.concatenate([x1, x2, a], axis=-1)
    x = jax.nn.relu(lin(x, params["l1_w"], params["l1_b"]))
    x = jax.nn.relu(lin(x, params["l2_w"], params["l2_b"]))
    return lin(x, params["l3_w"], params["l3_b"])


# -------------------------------- main ----------------------------------------
if __name__ == "__main__":
    input_size = 8
    embedding_size = 16
    action_dim = 4
    output_size = 1
    n_agents = 8           # row 0 = self, row 1 = extra-self, rows 2.. = neighbors
    batch = 256            # 2 grid steps of 128

    key = jax.random.PRNGKey(0)
    key, ks, ka, kp = jax.random.split(key, 4)
    s_batch = jax.random.normal(ks, (batch, n_agents, input_size), jnp.float32)
    a_batch = jax.random.normal(ka, (batch, action_dim), jnp.float32)
    params = init_params(kp, input_size, embedding_size, action_dim, output_size)

    # One-time parameter prep (transpose / split / pad hoisted out of the call).
    slab, offs = pack_params(params, output_size=output_size)

    dims = dict(input_size=input_size, embedding_size=embedding_size,
                action_dim=action_dim, output_size=output_size, block_b=128)
    fwd = jax.jit(functools.partial(critic_gnn_forward_batched, offs=offs, **dims))

    out = jax.block_until_ready(fwd(s_batch, a_batch, slab))
    ref = jax.block_until_ready(
        jax.vmap(lambda s, a: reference_forward_single(s, a, params))(
            s_batch, a_batch))

    assert out.shape == (batch, output_size), out.shape
    assert jnp.allclose(out, ref, atol=1e-4, rtol=1e-4), (out[:4], ref[:4])

    # Single-sample path keeps the original module's forward(s, a) semantics.
    single = jax.block_until_ready(
        critic_gnn_forward(s_batch[0], a_batch[0], slab, offs, **dims))
    assert single.shape == (output_size,)
    assert jnp.allclose(single, ref[0], atol=1e-4, rtol=1e-4), (single, ref[0])

    print("KERNEL_OK")
</pallas_src>

<mosaic_0001>
module attributes {stable_mosaic.version = 11 : i64} {
  func.func @_critic_gnn_kernel(%arg0: i32, %arg1: memref<128x16xf32, #tpu.memory_space<vmem>>, %arg2: memref<6x128x8xf32, #tpu.memory_space<vmem>>, %arg3: memref<128x4xf32, #tpu.memory_space<vmem>>, %arg4: memref<264x128xf32, #tpu.memory_space<vmem>>, %arg5: memref<128x128xf32, #tpu.memory_space<vmem>>) attributes {dimension_semantics = [#tpu.dimension_semantics<parallel>], iteration_bounds = array<i64: 2>, scalar_prefetch = 0 : i64, scratch_operands = 0 : i64, tpu.core_type = #tpu.core_type<tc>, window_params = [{transform_indices = @transform_0, window_bounds = array<i64: 128, 16>}, {transform_indices = @transform_1, window_bounds = array<i64: 6, 128, 8>}, {transform_indices = @transform_2, window_bounds = array<i64: 128, 4>}, {pipeline_mode = #tpu.pipeline_mode<synchronous>, transform_indices = @transform_3, window_bounds = array<i64: 264, 128>}, {transform_indices = @transform_4, window_bounds = array<i64: 128, 128>}]} {
    %c0 = arith.constant 0 : index
    %c0_0 = arith.constant 0 : index
    %0 = vector.load %arg1[%c0, %c0_0] : memref<128x16xf32, #tpu.memory_space<vmem>>, vector<128x16xf32>
    %c0_1 = arith.constant 0 : index
    %c0_2 = arith.constant 0 : index
    %1 = vector.load %arg4[%c0_1, %c0_2] : memref<264x128xf32, #tpu.memory_space<vmem>>, vector<16x32xf32>
    %cst = arith.constant dense<0.000000e+00> : vector<128x32xf32>
    %2 = tpu.matmul %0, %1, %cst {dimension_numbers = #tpu.dot_dimension_numbers<[1], [0], [0], [1], [0, 0, 1, 1], [], []>} : vector<128x16xf32>, vector<16x32xf32>, vector<128x32xf32> -> vector<128x32xf32>
    %c16 = arith.constant 16 : index
    %c0_3 = arith.constant 0 : index
    %3 = vector.load %arg4[%c16, %c0_3] : memref<264x128xf32, #tpu.memory_space<vmem>>, vector<1x32xf32>
    %4 = vector.broadcast %3 : vector<1x32xf32> to vector<128x32xf32>
    %5 = arith.addf %2, %4 : vector<128x32xf32>
    %cst_4 = arith.constant 0.000000e+00 : f32
    %6 = vector.broadcast %cst_4 : f32 to vector<128x32xf32>
    %7 = arith.maximumf %5, %6 : vector<128x32xf32>
    %c24 = arith.constant 24 : index
    %c0_5 = arith.constant 0 : index
    %8 = vector.load %arg4[%c24, %c0_5] : memref<264x128xf32, #tpu.memory_space<vmem>>, vector<32x16xf32>
    %cst_6 = arith.constant dense<0.000000e+00> : vector<128x16xf32>
    %9 = tpu.matmul %7, %8, %cst_6 {dimension_numbers = #tpu.dot_dimension_numbers<[1], [0], [0], [1], [0, 0, 1, 1], [], []>} : vector<128x32xf32>, vector<32x16xf32>, vector<128x16xf32> -> vector<128x16xf32>
    %c56 = arith.constant 56 : index
    %c0_7 = arith.constant 0 : index
    %10 = vector.load %arg4[%c56, %c0_7] : memref<264x128xf32, #tpu.memory_space<vmem>>, vector<1x16xf32>
    %11 = vector.broadcast %10 : vector<1x16xf32> to vector<128x16xf32>
    %12 = arith.addf %9, %11 : vector<128x16xf32>
    %c64 = arith.constant 64 : index
    %c0_8 = arith.constant 0 : index
    %13 = vector.load %arg4[%c64, %c0_8] : memref<264x128xf32, #tpu.memory_space<vmem>>, vector<8x32xf32>
    %c72 = arith.constant 72 : index
    %c0_9 = arith.constant 0 : index
    %14 = vector.load %arg4[%c72, %c0_9] : memref<264x128xf32, #tpu.memory_space<vmem>>, vector<1x32xf32>
    %c0_10 = arith.constant 0 : index
    %c0_11 = arith.constant 0 : index
    %c0_12 = arith.constant 0 : index
    %15 = vector.load %arg2[%c0_10, %c0_11, %c0_12] : memref<6x128x8xf32, #tpu.memory_space<vmem>>, vector<1x128x8xf32>
    %16 = vector.shape_cast %15 : vector<1x128x8xf32> to vector<128x8xf32>
    %cst_13 = arith.constant dense<0.000000e+00> : vector<128x32xf32>
    %17 = tpu.matmul %16, %13, %cst_13 {dimension_numbers = #tpu.dot_dimension_numbers<[1], [0], [0], [1], [0, 0, 1, 1], [], []>} : vector<128x8xf32>, vector<8x32xf32>, vector<128x32xf32> -> vector<128x32xf32>
    %18 = vector.broadcast %14 : vector<1x32xf32> to vector<128x32xf32>
    %19 = arith.addf %17, %18 : vector<128x32xf32>
    %cst_14 = arith.constant 0.000000e+00 : f32
    %20 = vector.broadcast %cst_14 : f32 to vector<128x32xf32>
    %21 = arith.maximumf %19, %20 : vector<128x32xf32>
    %c1 = arith.constant 1 : index
    %c0_15 = arith.constant 0 : index
    %c0_16 = arith.constant 0 : index
    %22 = vector.load %arg2[%c1, %c0_15, %c0_16] : memref<6x128x8xf32, #tpu.memory_space<vmem>>, vector<1x128x8xf32>
    %23 = vector.shape_cast %22 : vector<1x128x8xf32> to vector<128x8xf32>
    %cst_17 = arith.constant dense<0.000000e+00> : vector<128x32xf32>
    %24 = tpu.matmul %23, %13, %cst_17 {dimension_numbers = #tpu.dot_dimension_numbers<[1], [0], [0], [1], [0, 0, 1, 1], [], []>} : vector<128x8xf32>, vector<8x32xf32>, vector<128x32xf32> -> vector<128x32xf32>
    %25 = vector.broadcast %14 : vector<1x32xf32> to vector<128x32xf32>
    %26 = arith.addf %24, %25 : vector<128x32xf32>
    %cst_18 = arith.constant 0.000000e+00 : f32
    %27 = vector.broadcast %cst_18 : f32 to vector<128x32xf32>
    %28 = arith.maximumf %26, %27 : vector<128x32xf32>
    %29 = arith.addf %21, %28 : vector<128x32xf32>
    %c2 = arith.constant 2 : index
    %c0_19 = arith.constant 0 : index
    %c0_20 = arith.constant 0 : index
    %30 = vector.load %arg2[%c2, %c0_19, %c0_20] : memref<6x128x8xf32, #tpu.memory_space<vmem>>, vector<1x128x8xf32>
    %31 = vector.shape_cast %30 : vector<1x128x8xf32> to vector<128x8xf32>
    %cst_21 = arith.constant dense<0.000000e+00> : vector<128x32xf32>
    %32 = tpu.matmul %31, %13, %cst_21 {dimension_numbers = #tpu.dot_dimension_numbers<[1], [0], [0], [1], [0, 0, 1, 1], [], []>} : vector<128x8xf32>, vector<8x32xf32>, vector<128x32xf32> -> vector<128x32xf32>
    %33 = vector.broadcast %14 : vector<1x32xf32> to vector<128x32xf32>
    %34 = arith.addf %32, %33 : vector<128x32xf32>
    %cst_22 = arith.constant 0.000000e+00 : f32
    %35 = vector.broadcast %cst_22 : f32 to vector<128x32xf32>
    %36 = arith.maximumf %34, %35 : vector<128x32xf32>
    %37 = arith.addf %29, %36 : vector<128x32xf32>
    %c3 = arith.constant 3 : index
    %c0_23 = arith.constant 0 : index
    %c0_24 = arith.constant 0 : index
    %38 = vector.load %arg2[%c3, %c0_23, %c0_24] : memref<6x128x8xf32, #tpu.memory_space<vmem>>, vector<1x128x8xf32>
    %39 = vector.shape_cast %38 : vector<1x128x8xf32> to vector<128x8xf32>
    %cst_25 = arith.constant dense<0.000000e+00> : vector<128x32xf32>
    %40 = tpu.matmul %39, %13, %cst_25 {dimension_numbers = #tpu.dot_dimension_numbers<[1], [0], [0], [1], [0, 0, 1, 1], [], []>} : vector<128x8xf32>, vector<8x32xf32>, vector<128x32xf32> -> vector<128x32xf32>
    %41 = vector.broadcast %14 : vector<1x32xf32> to vector<128x32xf32>
    %42 = arith.addf %40, %41 : vector<128x32xf32>
    %cst_26 = arith.constant 0.000000e+00 : f32
    %43 = vector.broadcast %cst_26 : f32 to vector<128x32xf32>
    %44 = arith.maximumf %42, %43 : vector<128x32xf32>
    %45 = arith.addf %37, %44 : vector<128x32xf32>
    %c4 = arith.constant 4 : index
    %c0_27 = arith.constant 0 : index
    %c0_28 = arith.constant 0 : index
    %46 = vector.load %arg2[%c4, %c0_27, %c0_28] : memref<6x128x8xf32, #tpu.memory_space<vmem>>, vector<1x128x8xf32>
    %47 = vector.shape_cast %46 : vector<1x128x8xf32> to vector<128x8xf32>
    %cst_29 = arith.constant dense<0.000000e+00> : vector<128x32xf32>
    %48 = tpu.matmul %47, %13, %cst_29 {dimension_numbers = #tpu.dot_dimension_numbers<[1], [0], [0], [1], [0, 0, 1, 1], [], []>} : vector<128x8xf32>, vector<8x32xf32>, vector<128x32xf32> -> vector<128x32xf32>
    %49 = vector.broadcast %14 : vector<1x32xf32> to vector<128x32xf32>
    %50 = arith.addf %48, %49 : vector<128x32xf32>
    %cst_30 = arith.constant 0.000000e+00 : f32
    %51 = vector.broadcast %cst_30 : f32 to vector<128x32xf32>
    %52 = arith.maximumf %50, %51 : vector<128x32xf32>
    %53 = arith.addf %45, %52 : vector<128x32xf32>
    %c5 = arith.constant 5 : index
    %c0_31 = arith.constant 0 : index
    %c0_32 = arith.constant 0 : index
    %54 = vector.load %arg2[%c5, %c0_31, %c0_32] : memref<6x128x8xf32, #tpu.memory_space<vmem>>, vector<1x128x8xf32>
    %55 = vector.shape_cast %54 : vector<1x128x8xf32> to vector<128x8xf32>
    %cst_33 = arith.constant dense<0.000000e+00> : vector<128x32xf32>
    %56 = tpu.matmul %55, %13, %cst_33 {dimension_numbers = #tpu.dot_dimension_numbers<[1], [0], [0], [1], [0, 0, 1, 1], [], []>} : vector<128x8xf32>, vector<8x32xf32>, vector<128x32xf32> -> vector<128x32xf32>
    %57 = vector.broadcast %14 : vector<1x32xf32> to vector<128x32xf32>
    %58 = arith.addf %56, %57 : vector<128x32xf32>
    %cst_34 = arith.constant 0.000000e+00 : f32
    %59 = vector.broadcast %cst_34 : f32 to vector<128x32xf32>
    %60 = arith.maximumf %58, %59 : vector<128x32xf32>
    %61 = arith.addf %53, %60 : vector<128x32xf32>
    %cst_35 = arith.constant 0.166666672 : f32
    %62 = vector.broadcast %cst_35 : f32 to vector<128x32xf32>
    %63 = arith.mulf %61, %62 : vector<128x32xf32>
    %c80 = arith.constant 80 : index
    %c0_36 = arith.constant 0 : index
    %64 = vector.load %arg4[%c80, %c0_36] : memref<264x128xf32, #tpu.memory_space<vmem>>, vector<32x16xf32>
    %cst_37 = arith.constant dense<0.000000e+00> : vector<128x16xf32>
    %65 = tpu.matmul %63, %64, %cst_37 {dimension_numbers = #tpu.dot_dimension_numbers<[1], [0], [0], [1], [0, 0, 1, 1], [], []>} : vector<128x32xf32>, vector<32x16xf32>, vector<128x16xf32> -> vector<128x16xf32>
    %c112 = arith.constant 112 : index
    %c0_38 = arith.constant 0 : index
    %66 = vector.load %arg4[%c112, %c0_38] : memref<264x128xf32, #tpu.memory_space<vmem>>, vector<1x16xf32>
    %67 = vector.broadcast %66 : vector<1x16xf32> to vector<128x16xf32>
    %68 = arith.addf %65, %67 : vector<128x16xf32>
    %c120 = arith.constant 120 : index
    %c0_39 = arith.constant 0 : index
    %69 = vector.load %arg4[%c120, %c0_39] : memref<264x128xf32, #tpu.memory_space<vmem>>, vector<16x64xf32>
    %cst_40 = arith.constant dense<0.000000e+00> : vector<128x64xf32>
    %70 = tpu.matmul %12, %69, %cst_40 {dimension_numbers = #tpu.dot_dimension_numbers<[1], [0], [0], [1], [0, 0, 1, 1], [], []>} : vector<128x16xf32>, vector<16x64xf32>, vector<128x64xf32> -> vector<128x64xf32>
    %c136 = arith.constant 136 : index
    %c0_41 = arith.constant 0 : index
    %71 = vector.load %arg4[%c136, %c0_41] : memref<264x128xf32, #tpu.memory_space<vmem>>, vector<16x64xf32>
    %cst_42 = arith.constant dense<0.000000e+00> : vector<128x64xf32>
    %72 = tpu.matmul %68, %71, %cst_42 {dimension_numbers = #tpu.dot_dimension_numbers<[1], [0], [0], [1], [0, 0, 1, 1], [], []>} : vector<128x16xf32>, vector<16x64xf32>, vector<128x64xf32> -> vector<128x64xf32>
    %73 = arith.addf %70, %72 : vector<128x64xf32>
    %c0_43 = arith.constant 0 : index
    %c0_44 = arith.constant 0 : index
    %74 = vector.load %arg3[%c0_43, %c0_44] : memref<128x4xf32, #tpu.memory_space<vmem>>, vector<128x4xf32>
    %c152 = arith.constant 152 : index
    %c0_45 = arith.constant 0 : index
    %75 = vector.load %arg4[%c152, %c0_45] : memref<264x128xf32, #tpu.memory_space<vmem>>, vector<4x64xf32>
    %cst_46 = arith.constant dense<0.000000e+00> : vector<128x64xf32>
    %76 = tpu.matmul %74, %75, %cst_46 {dimension_numbers = #tpu.dot_dimension_numbers<[1], [0], [0], [1], [0, 0, 1, 1], [], []>} : vector<128x4xf32>, vector<4x64xf32>, vector<128x64xf32> -> vector<128x64xf32>
    %77 = arith.addf %73, %76 : vector<128x64xf32>
    %c160 = arith.constant 160 : index
    %c0_47 = arith.constant 0 : index
    %78 = vector.load %arg4[%c160, %c0_47] : memref<264x128xf32, #tpu.memory_space<vmem>>, vector<1x64xf32>
    %79 = vector.broadcast %78 : vector<1x64xf32> to vector<128x64xf32>
    %80 = arith.addf %77, %79 : vector<128x64xf32>
    %cst_48 = arith.constant 0.000000e+00 : f32
    %81 = vector.broadcast %cst_48 : f32 to vector<128x64xf32>
    %82 = arith.maximumf %80, %81 : vector<128x64xf32>
    %c168 = arith.constant 168 : index
    %c0_49 = arith.constant 0 : index
    %83 = vector.load %arg4[%c168, %c0_49] : memref<264x128xf32, #tpu.memory_space<vmem>>, vector<64x16xf32>
    %cst_50 = arith.constant dense<0.000000e+00> : vector<128x16xf32>
    %84 = tpu.matmul %82, %83, %cst_50 {dimension_numbers = #tpu.dot_dimension_numbers<[1], [0], [0], [1], [0, 0, 1, 1], [], []>} : vector<128x64xf32>, vector<64x16xf32>, vector<128x16xf32> -> vector<128x16xf32>
    %c232 = arith.constant 232 : index
    %c0_51 = arith.constant 0 : index
    %85 = vector.load %arg4[%c232, %c0_51] : memref<264x128xf32, #tpu.memory_space<vmem>>, vector<1x16xf32>
    %86 = vector.broadcast %85 : vector<1x16xf32> to vector<128x16xf32>
    %87 = arith.addf %84, %86 : vector<128x16xf32>
    %cst_52 = arith.constant 0.000000e+00 : f32
    %88 = vector.broadcast %cst_52 : f32 to vector<128x16xf32>
    %89 = arith.maximumf %87, %88 : vector<128x16xf32>
    %c240 = arith.constant 240 : index
    %c0_53 = arith.constant 0 : index
    %90 = vector.load %arg4[%c240, %c0_53] : memref<264x128xf32, #tpu.memory_space<vmem>>, vector<16x128xf32>
    %cst_54 = arith.constant dense<0.000000e+00> : vector<128x128xf32>
    %91 = tpu.matmul %89, %90, %cst_54 {dimension_numbers = #tpu.dot_dimension_numbers<[1], [0], [0], [1], [0, 0, 1, 1], [], []>} : vector<128x16xf32>, vector<16x128xf32>, vector<128x128xf32> -> vector<128x128xf32>
    %c256 = arith.constant 256 : index
    %c0_55 = arith.constant 0 : index
    %92 = vector.load %arg4[%c256, %c0_55] : memref<264x128xf32, #tpu.memory_space<vmem>>, vector<1x128xf32>
    %93 = vector.broadcast %92 : vector<1x128xf32> to vector<128x128xf32>
    %94 = arith.addf %91, %93 : vector<128x128xf32>
    %c0_56 = arith.constant 0 : index
    %c0_57 = arith.constant 0 : index
    %95 = vector.load %arg5[%c0_56, %c0_57] : memref<128x128xf32, #tpu.memory_space<vmem>>, vector<128x128xf32>
    tpu.vector_store %arg5[%c0_56, %c0_57], %94 {strides = array<i32>} : memref<128x128xf32, #tpu.memory_space<vmem>>, vector<128x128xf32>,
    return
  }
  func.func @transform_0(%arg0: i32) -> (i32, i32) {
    %c0_i32 = arith.constant 0 : i32
    %c0_i32_0 = arith.constant 0 : i32
    return %arg0, %c0_i32 : i32, i32
  }
  func.func @transform_1(%arg0: i32) -> (i32, i32, i32) {
    %c0_i32 = arith.constant 0 : i32
    %c0_i32_0 = arith.constant 0 : i32
    %c0_i32_1 = arith.constant 0 : i32
    return %c0_i32, %arg0, %c0_i32_0 : i32, i32, i32
  }
  func.func @transform_2(%arg0: i32) -> (i32, i32) {
    %c0_i32 = arith.constant 0 : i32
    %c0_i32_0 = arith.constant 0 : i32
    return %arg0, %c0_i32 : i32, i32
  }
  func.func @transform_3(%arg0: i32) -> (i32, i32) {
    %c0_i32 = arith.constant 0 : i32
    %c0_i32_0 = arith.constant 0 : i32
    %c0_i32_1 = arith.constant 0 : i32
    return %c0_i32, %c0_i32_0 : i32, i32
  }
  func.func @transform_4(%arg0: i32) -> (i32, i32) {
    %c0_i32 = arith.constant 0 : i32
    %c0_i32_0 = arith.constant 0 : i32
    return %arg0, %c0_i32 : i32, i32
  }
}

</mosaic_0001>

<bundles_post_ra>
// kernel: critic_gnn_forward_batched.1
= control target key start
LH: loop header
LB: loop body
LE: loop exit
PB: predicated region body
PF: predicated region fallthrough
CT: control target
= control target key end

     0   :  { %s5074_s15 = smov 0   ;;  %s5076_s16 = smov 0   ;;  %s6210_s0 = inlined_call_operand.vmem [shape: f32[256,16], index: 0, kind: input, shape index: {}]   ;;  %s6211_s1 = inlined_call_operand.vmem [shape: f32[6,256,8], index: 1, kind: input, shape index: {}]   ;;  %s6212_s2 = inlined_call_operand.vmem [shape: f32[256,4], index: 2, kind: input, shape index: {}]   ;;  %s6213_s3 = inlined_call_operand.vmem [shape: f32[264,128], index: 3, kind: input, shape index: {}]   ;;  %s6214_s4 = inlined_call_operand.vmem [shape: f32[256,128], index: 4, kind: output, shape index: {}]  }
   0x1   :  { %s5078_s17 = smov 0  }
   0x2 LB: > { %s3938_s18 = sadd.s32 4294967295, %s5047_s17   ;;  %s5091_s19 = sadd.s32 1, %s5047_s17   ;;  %s5047_s17 = sphi %s5078_s17, %s6251_s17   ;;  %s5043_s16 = sphi %s5076_s16, %s6250_s16   ;;  %s5039_s15 = sphi %s5074_s15, %s6249_s15  }
   0x3   : > { %s44_s20 = ssub.s32 %s5047_s17, %s5091_s19  ;;  %s47_s21 = sadd.s32 1, %s5043_s16 }
   0x4   : > { %p45_p0 = scmp.eq.s32.totalorder %s44_s20, 0  ;;  %p54_p1 = scmp.ne.s32.totalorder %s5043_s16, %s5039_s15 }
   0x5   : > { %p55_p2 = scmp.eq.s32.totalorder %s5047_s17, 0  ;;  %p3941_p4 = scmp.ge.s32.totalorder %s5047_s17, 2 }
   0x6   : > { %s5100_s22 = scalar_select %p45_p0, %s5043_s16, %s47_s21  }
   0x7   : > { %p56_p3 = por %p55_p2, %p54_p1  ;;  %156 = sbr.rel (%p3941_p4) target bundleno = 67 (0x43), region = 20 }
   0xe   : > { %168 = sbr.rel (!%p56_p3) target bundleno = 67 (0x43), region = 28  ;;  %s170_s23 = sand.u32 (%p56_p3), 1, %s5043_s16  }
   0xf   : > { %s4265_s24 = sshll.u32 (%p56_p3), %s5047_s17, 7  ;;  %s4999_s25 = smul.u32 (%p56_p3), 768, %s170_s23 }
  0x10   : > { %s5108_s28 = scalar_lea.vmem (%p56_p3), %s6211_s1, %s4265_s24 }
  0x11   : > { %v393_v0 = vld [vmem:[%s5108_s28] sm:$0xff] (%p56_p3)  ;;  %v395_v1 = vld [vmem:[%s5108_s28 + $0x8] sm:$0xff] (%p56_p3)  ;;  %v397_v2 = vld [vmem:[%s5108_s28 + $0x10] sm:$0xff] (%p56_p3)  ;;  %s5116_s29 = scalar_lea.vmem (%p56_p3), [#allocation2], %s4999_s25 }
  0x12   : > { %v399_v3 = vld [vmem:[%s5108_s28 + $0x18] sm:$0xff] (%p56_p3)  ;;  %v401_v4 = vld [vmem:[%s5108_s28 + $0x20] sm:$0xff] (%p56_p3)  ;;  %v403_v5 = vld [vmem:[%s5108_s28 + $0x28] sm:$0xff] (%p56_p3)  ;;  %394 = vst [vmem:[%s5116_s29] sm:$0xff] (%p56_p3), %v393_v0 }
  0x13   : > { %396 = vst [vmem:[%s5116_s29 + $0x8] sm:$0xff] (%p56_p3), %v395_v1  ;;  %398 = vst [vmem:[%s5116_s29 + $0x10] sm:$0xff] (%p56_p3), %v397_v2  ;;  %v405_v6 = vld [vmem:[%s5108_s28 + $0x30] sm:$0xff] (%p56_p3)  ;;  %v407_v7 = vld [vmem:[%s5108_s28 + $0x38] sm:$0xff] (%p56_p3) }
  0x14   : > { %400 = vst [vmem:[%s5116_s29 + $0x18] sm:$0xff] (%p56_p3), %v399_v3  ;;  %402 = vst [vmem:[%s5116_s29 + $0x20] sm:$0xff] (%p56_p3), %v401_v4  ;;  %v409_v8 = vld [vmem:[%s5108_s28 + $0x40] sm:$0xff] (%p56_p3)  ;;  %v411_v9 = vld [vmem:[%s5108_s28 + $0x48] sm:$0xff] (%p56_p3) }
  0x15   : > { %404 = vst [vmem:[%s5116_s29 + $0x28] sm:$0xff] %v403_v5  ;;  %406 = vst [vmem:[%s5116_s29 + $0x30] sm:$0xff] %v405_v6  ;;  %v413_v10 = vld [vmem:[%s5108_s28 + $0x50] sm:$0xff]  ;;  %v415_v11 = vld [vmem:[%s5108_s28 + $0x58] sm:$0xff] }
  0x16   : > { %408 = vst [vmem:[%s5116_s29 + $0x38] sm:$0xff] %v407_v7  ;;  %410 = vst [vmem:[%s5116_s29 + $0x40] sm:$0xff] %v409_v8  ;;  %v417_v12 = vld [vmem:[%s5108_s28 + $0x60] sm:$0xff]  ;;  %v419_v13 = vld [vmem:[%s5108_s28 + $0x68] sm:$0xff] }
  0x17   : > { %412 = vst [vmem:[%s5116_s29 + $0x48] sm:$0xff] %v411_v9  ;;  %414 = vst [vmem:[%s5116_s29 + $0x50] sm:$0xff] %v413_v10  ;;  %v421_v14 = vld [vmem:[%s5108_s28 + $0x70] sm:$0xff]  ;;  %v423_v15 = vld [vmem:[%s5108_s28 + $0x78] sm:$0xff] }
  0x18   : > { %416 = vst [vmem:[%s5116_s29 + $0x58] sm:$0xff] %v415_v11  ;;  %418 = vst [vmem:[%s5116_s29 + $0x60] sm:$0xff] %v417_v12  ;;  %v425_v16 = vld [vmem:[%s5108_s28 + $0x100] sm:$0xff]  ;;  %v427_v17 = vld [vmem:[%s5108_s28 + $0x108] sm:$0xff] }
  0x19   : > { %420 = vst [vmem:[%s5116_s29 + $0x68] sm:$0xff] %v419_v13  ;;  %422 = vst [vmem:[%s5116_s29 + $0x70] sm:$0xff] %v421_v14  ;;  %v429_v18 = vld [vmem:[%s5108_s28 + $0x110] sm:$0xff]  ;;  %v431_v19 = vld [vmem:[%s5108_s28 + $0x118] sm:$0xff] }
  0x1a   : > { %424 = vst [vmem:[%s5116_s29 + $0x78] sm:$0xff] %v423_v15  ;;  %426 = vst [vmem:[%s5116_s29 + $0x80] sm:$0xff] %v425_v16  ;;  %v433_v20 = vld [vmem:[%s5108_s28 + $0x120] sm:$0xff]  ;;  %v435_v21 = vld [vmem:[%s5108_s28 + $0x128] sm:$0xff] }
  0x1b   : > { %428 = vst [vmem:[%s5116_s29 + $0x88] sm:$0xff] %v427_v17  ;;  %430 = vst [vmem:[%s5116_s29 + $0x90] sm:$0xff] %v429_v18  ;;  %v437_v22 = vld [vmem:[%s5108_s28 + $0x130] sm:$0xff]  ;;  %v439_v23 = vld [vmem:[%s5108_s28 + $0x138] sm:$0xff] }
  0x1c   : > { %432 = vst [vmem:[%s5116_s29 + $0x98] sm:$0xff] %v431_v19  ;;  %434 = vst [vmem:[%s5116_s29 + $0xa0] sm:$0xff] %v433_v20  ;;  %v441_v24 = vld [vmem:[%s5108_s28 + $0x140] sm:$0xff]  ;;  %v443_v25 = vld [vmem:[%s5108_s28 + $0x148] sm:$0xff] }
  0x1d   : > { %436 = vst [vmem:[%s5116_s29 + $0xa8] sm:$0xff] %v435_v21  ;;  %438 = vst [vmem:[%s5116_s29 + $0xb0] sm:$0xff] %v437_v22  ;;  %v445_v26 = vld [vmem:[%s5108_s28 + $0x150] sm:$0xff]  ;;  %v447_v27 = vld [vmem:[%s5108_s28 + $0x158] sm:$0xff] }
  0x1e   : > { %440 = vst [vmem:[%s5116_s29 + $0xb8] sm:$0xff] %v439_v23  ;;  %442 = vst [vmem:[%s5116_s29 + $0xc0] sm:$0xff] %v441_v24  ;;  %v449_v28 = vld [vmem:[%s5108_s28 + $0x160] sm:$0xff]  ;;  %v451_v29 = vld [vmem:[%s5108_s28 + $0x168] sm:$0xff] }
  0x1f   : > { %444 = vst [vmem:[%s5116_s29 + $0xc8] sm:$0xff] %v443_v25  ;;  %446 = vst [vmem:[%s5116_s29 + $0xd0] sm:$0xff] %v445_v26  ;;  %v453_v30 = vld [vmem:[%s5108_s28 + $0x170] sm:$0xff]  ;;  %v455_v31 = vld [vmem:[%s5108_s28 + $0x178] sm:$0xff] }
  0x20   : > { %448 = vst [vmem:[%s5116_s29 + $0xd8] sm:$0xff] %v447_v27  ;;  %450 = vst [vmem:[%s5116_s29 + $0xe0] sm:$0xff] %v449_v28  ;;  %v457_v32 = vld [vmem:[%s5108_s28 + $0x200] sm:$0xff]  ;;  %v459_v33 = vld [vmem:[%s5108_s28 + $0x208] sm:$0xff] }
  0x21   : > { %452 = vst [vmem:[%s5116_s29 + $0xe8] sm:$0xff] %v451_v29  ;;  %454 = vst [vmem:[%s5116_s29 + $0xf0] sm:$0xff] %v453_v30  ;;  %v461_v34 = vld [vmem:[%s5108_s28 + $0x210] sm:$0xff]  ;;  %v463_v35 = vld [vmem:[%s5108_s28 + $0x218] sm:$0xff] }
  0x22   : > { %456 = vst [vmem:[%s5116_s29 + $0xf8] sm:$0xff] %v455_v31  ;;  %458 = vst [vmem:[%s5116_s29 + $0x100] sm:$0xff] %v457_v32  ;;  %v465_v36 = vld [vmem:[%s5108_s28 + $0x220] sm:$0xff]  ;;  %v467_v37 = vld [vmem:[%s5108_s28 + $0x228] sm:$0xff] }
  0x23   : > { %460 = vst [vmem:[%s5116_s29 + $0x108] sm:$0xff] %v459_v33  ;;  %462 = vst [vmem:[%s5116_s29 + $0x110] sm:$0xff] %v461_v34  ;;  %v469_v38 = vld [vmem:[%s5108_s28 + $0x230] sm:$0xff]  ;;  %v471_v39 = vld [vmem:[%s5108_s28 + $0x238] sm:$0xff] }
  0x24   : > { %464 = vst [vmem:[%s5116_s29 + $0x118] sm:$0xff] %v463_v35  ;;  %466 = vst [vmem:[%s5116_s29 + $0x120] sm:$0xff] %v465_v36  ;;  %v473_v40 = vld [vmem:[%s5108_s28 + $0x240] sm:$0xff]  ;;  %v475_v41 = vld [vmem:[%s5108_s28 + $0x248] sm:$0xff] }
  0x25   : > { %468 = vst [vmem:[%s5116_s29 + $0x128] sm:$0xff] %v467_v37  ;;  %470 = vst [vmem:[%s5116_s29 + $0x130] sm:$0xff] %v469_v38  ;;  %v477_v42 = vld [vmem:[%s5108_s28 + $0x250] sm:$0xff]  ;;  %v479_v43 = vld [vmem:[%s5108_s28 + $0x258] sm:$0xff] }
  0x26   : > { %472 = vst [vmem:[%s5116_s29 + $0x138] sm:$0xff] %v471_v39  ;;  %474 = vst [vmem:[%s5116_s29 + $0x140] sm:$0xff] %v473_v40  ;;  %v481_v44 = vld [vmem:[%s5108_s28 + $0x260] sm:$0xff]  ;;  %v483_v45 = vld [vmem:[%s5108_s28 + $0x268] sm:$0xff] }
  0x27   : > { %476 = vst [vmem:[%s5116_s29 + $0x148] sm:$0xff] %v475_v41  ;;  %478 = vst [vmem:[%s5116_s29 + $0x150] sm:$0xff] %v477_v42  ;;  %v485_v46 = vld [vmem:[%s5108_s28 + $0x270] sm:$0xff]  ;;  %v487_v47 = vld [vmem:[%s5108_s28 + $0x278] sm:$0xff] }
  0x28   : > { %480 = vst [vmem:[%s5116_s29 + $0x158] sm:$0xff] %v479_v43  ;;  %482 = vst [vmem:[%s5116_s29 + $0x160] sm:$0xff] %v481_v44  ;;  %v489_v48 = vld [vmem:[%s5108_s28 + $0x300] sm:$0xff]  ;;  %v491_v49 = vld [vmem:[%s5108_s28 + $0x308] sm:$0xff] }
  0x29   : > { %484 = vst [vmem:[%s5116_s29 + $0x168] sm:$0xff] %v483_v45  ;;  %486 = vst [vmem:[%s5116_s29 + $0x170] sm:$0xff] %v485_v46  ;;  %v493_v50 = vld [vmem:[%s5108_s28 + $0x310] sm:$0xff]  ;;  %v495_v51 = vld [vmem:[%s5108_s28 + $0x318] sm:$0xff] }
  0x2a   : > { %488 = vst [vmem:[%s5116_s29 + $0x178] sm:$0xff] %v487_v47  ;;  %490 = vst [vmem:[%s5116_s29 + $0x180] sm:$0xff] %v489_v48  ;;  %v497_v52 = vld [vmem:[%s5108_s28 + $0x320] sm:$0xff]  ;;  %v499_v53 = vld [vmem:[%s5108_s28 + $0x328] sm:$0xff] }
  0x2b   : > { %492 = vst [vmem:[%s5116_s29 + $0x188] sm:$0xff] %v491_v49  ;;  %494 = vst [vmem:[%s5116_s29 + $0x190] sm:$0xff] %v493_v50  ;;  %v501_v54 = vld [vmem:[%s5108_s28 + $0x330] sm:$0xff]  ;;  %v503_v55 = vld [vmem:[%s5108_s28 + $0x338] sm:$0xff] }
  0x2c   : > { %496 = vst [vmem:[%s5116_s29 + $0x198] sm:$0xff] %v495_v51  ;;  %498 = vst [vmem:[%s5116_s29 + $0x1a0] sm:$0xff] %v497_v52  ;;  %v505_v56 = vld [vmem:[%s5108_s28 + $0x340] sm:$0xff]  ;;  %v507_v57 = vld [vmem:[%s5108_s28 + $0x348] sm:$0xff] }
  0x2d   : > { %500 = vst [vmem:[%s5116_s29 + $0x1a8] sm:$0xff] %v499_v53  ;;  %502 = vst [vmem:[%s5116_s29 + $0x1b0] sm:$0xff] %v501_v54  ;;  %v509_v58 = vld [vmem:[%s5108_s28 + $0x350] sm:$0xff]  ;;  %v511_v59 = vld [vmem:[%s5108_s28 + $0x358] sm:$0xff] }
  0x2e   : > { %504 = vst [vmem:[%s5116_s29 + $0x1b8] sm:$0xff] %v503_v55  ;;  %506 = vst [vmem:[%s5116_s29 + $0x1c0] sm:$0xff] %v505_v56  ;;  %v513_v60 = vld [vmem:[%s5108_s28 + $0x360] sm:$0xff]  ;;  %v515_v61 = vld [vmem:[%s5108_s28 + $0x368] sm:$0xff] }
  0x2f   : > { %508 = vst [vmem:[%s5116_s29 + $0x1c8] sm:$0xff] %v507_v57  ;;  %510 = vst [vmem:[%s5116_s29 + $0x1d0] sm:$0xff] %v509_v58  ;;  %v517_v62 = vld [vmem:[%s5108_s28 + $0x370] sm:$0xff]  ;;  %v519_v63 = vld [vmem:[%s5108_s28 + $0x378] sm:$0xff] }
  0x30   : > { %512 = vst [vmem:[%s5116_s29 + $0x1d8] sm:$0xff] %v511_v59  ;;  %514 = vst [vmem:[%s5116_s29 + $0x1e0] sm:$0xff] %v513_v60  ;;  %v521_v0 = vld [vmem:[%s5108_s28 + $0x400] sm:$0xff]  ;;  %v523_v1 = vld [vmem:[%s5108_s28 + $0x408] sm:$0xff] }
  0x31   : > { %516 = vst [vmem:[%s5116_s29 + $0x1e8] sm:$0xff] %v515_v61  ;;  %518 = vst [vmem:[%s5116_s29 + $0x1f0] sm:$0xff] %v517_v62  ;;  %v525_v2 = vld [vmem:[%s5108_s28 + $0x410] sm:$0xff]  ;;  %v527_v3 = vld [vmem:[%s5108_s28 + $0x418] sm:$0xff] }
  0x32   : > { %520 = vst [vmem:[%s5116_s29 + $0x1f8] sm:$0xff] %v519_v63  ;;  %522 = vst [vmem:[%s5116_s29 + $0x200] sm:$0xff] %v521_v0  ;;  %v529_v4 = vld [vmem:[%s5108_s28 + $0x420] sm:$0xff]  ;;  %v531_v5 = vld [vmem:[%s5108_s28 + $0x428] sm:$0xff] }
  0x33   : > { %524 = vst [vmem:[%s5116_s29 + $0x208] sm:$0xff] %v523_v1  ;;  %526 = vst [vmem:[%s5116_s29 + $0x210] sm:$0xff] %v525_v2  ;;  %v533_v6 = vld [vmem:[%s5108_s28 + $0x430] sm:$0xff]  ;;  %v535_v7 = vld [vmem:[%s5108_s28 + $0x438] sm:$0xff] }
  0x34   : > { %528 = vst [vmem:[%s5116_s29 + $0x218] sm:$0xff] %v527_v3  ;;  %530 = vst [vmem:[%s5116_s29 + $0x220] sm:$0xff] %v529_v4  ;;  %v537_v8 = vld [vmem:[%s5108_s28 + $0x440] sm:$0xff]  ;;  %v539_v9 = vld [vmem:[%s5108_s28 + $0x448] sm:$0xff] }
  0x35   : > { %532 = vst [vmem:[%s5116_s29 + $0x228] sm:$0xff] %v531_v5  ;;  %534 = vst [vmem:[%s5116_s29 + $0x230] sm:$0xff] %v533_v6  ;;  %v541_v10 = vld [vmem:[%s5108_s28 + $0x450] sm:$0xff]  ;;  %v543_v11 = vld [vmem:[%s5108_s28 + $0x458] sm:$0xff] }
  0x36   : > { %536 = vst [vmem:[%s5116_s29 + $0x238] sm:$0xff] %v535_v7  ;;  %538 = vst [vmem:[%s5116_s29 + $0x240] sm:$0xff] %v537_v8  ;;  %v545_v12 = vld [vmem:[%s5108_s28 + $0x460] sm:$0xff]  ;;  %v547_v13 = vld [vmem:[%s5108_s28 + $0x468] sm:$0xff] }
  0x37   : > { %540 = vst [vmem:[%s5116_s29 + $0x248] sm:$0xff] %v539_v9  ;;  %542 = vst [vmem:[%s5116_s29 + $0x250] sm:$0xff] %v541_v10  ;;  %v549_v14 = vld [vmem:[%s5108_s28 + $0x470] sm:$0xff]  ;;  %v551_v15 = vld [vmem:[%s5108_s28 + $0x478] sm:$0xff] }
  0x38   : > { %544 = vst [vmem:[%s5116_s29 + $0x258] sm:$0xff] %v543_v11  ;;  %546 = vst [vmem:[%s5116_s29 + $0x260] sm:$0xff] %v545_v12  ;;  %v553_v16 = vld [vmem:[%s5108_s28 + $0x500] sm:$0xff]  ;;  %v555_v17 = vld [vmem:[%s5108_s28 + $0x508] sm:$0xff] }
  0x39   : > { %548 = vst [vmem:[%s5116_s29 + $0x268] sm:$0xff] %v547_v13  ;;  %550 = vst [vmem:[%s5116_s29 + $0x270] sm:$0xff] %v549_v14  ;;  %v557_v18 = vld [vmem:[%s5108_s28 + $0x510] sm:$0xff]  ;;  %v559_v19 = vld [vmem:[%s5108_s28 + $0x518] sm:$0xff] }
  0x3a   : > { %552 = vst [vmem:[%s5116_s29 + $0x278] sm:$0xff] %v551_v15  ;;  %554 = vst [vmem:[%s5116_s29 + $0x280] sm:$0xff] %v553_v16  ;;  %v561_v20 = vld [vmem:[%s5108_s28 + $0x520] sm:$0xff]  ;;  %v563_v21 = vld [vmem:[%s5108_s28 + $0x528] sm:$0xff] }
  0x3b   : > { %556 = vst [vmem:[%s5116_s29 + $0x288] sm:$0xff] %v555_v17  ;;  %558 = vst [vmem:[%s5116_s29 + $0x290] sm:$0xff] %v557_v18  ;;  %v565_v22 = vld [vmem:[%s5108_s28 + $0x530] sm:$0xff]  ;;  %v567_v23 = vld [vmem:[%s5108_s28 + $0x538] sm:$0xff] }
  0x3c   : > { %560 = vst [vmem:[%s5116_s29 + $0x298] sm:$0xff] %v559_v19  ;;  %562 = vst [vmem:[%s5116_s29 + $0x2a0] sm:$0xff] %v561_v20  ;;  %v569_v24 = vld [vmem:[%s5108_s28 + $0x540] sm:$0xff]  ;;  %v571_v25 = vld [vmem:[%s5108_s28 + $0x548] sm:$0xff] }
  0x3d   : > { %564 = vst [vmem:[%s5116_s29 + $0x2a8] sm:$0xff] %v563_v21  ;;  %566 = vst [vmem:[%s5116_s29 + $0x2b0] sm:$0xff] %v565_v22  ;;  %v573_v26 = vld [vmem:[%s5108_s28 + $0x550] sm:$0xff]  ;;  %v575_v27 = vld [vmem:[%s5108_s28 + $0x558] sm:$0xff] }
  0x3e   : > { %568 = vst [vmem:[%s5116_s29 + $0x2b8] sm:$0xff] %v567_v23  ;;  %570 = vst [vmem:[%s5116_s29 + $0x2c0] sm:$0xff] %v569_v24  ;;  %v577_v28 = vld [vmem:[%s5108_s28 + $0x560] sm:$0xff]  ;;  %v579_v29 = vld [vmem:[%s5108_s28 + $0x568] sm:$0xff] }
  0x3f   : > { %572 = vst [vmem:[%s5116_s29 + $0x2c8] sm:$0xff] %v571_v25  ;;  %574 = vst [vmem:[%s5116_s29 + $0x2d0] sm:$0xff] %v573_v26  ;;  %v581_v30 = vld [vmem:[%s5108_s28 + $0x570] sm:$0xff]  ;;  %v583_v31 = vld [vmem:[%s5108_s28 + $0x578] sm:$0xff] }
  0x40   : > { %576 = vst [vmem:[%s5116_s29 + $0x2d8] sm:$0xff] %v575_v27  ;;  %578 = vst [vmem:[%s5116_s29 + $0x2e0] sm:$0xff] %v577_v28 }
  0x41   : > { %580 = vst [vmem:[%s5116_s29 + $0x2e8] sm:$0xff] %v579_v29  ;;  %582 = vst [vmem:[%s5116_s29 + $0x2f0] sm:$0xff] %v581_v30 }
  0x42   : > { %584 = vst [vmem:[%s5116_s29 + $0x2f8] sm:$0xff] %v583_v31 }
  0x43 PF: > { %p3944_p5 = scmp.ge.s32.totalorder %s5047_s17, 1  ;;  %p598_p6 = scmp.lt.s32.totalorder %s5047_s17, 3 }
  0x45   : > { %p599_p7 = pnand %p3944_p5, %p598_p6 }
  0x47   : > { %602 = sbr.rel (%p599_p7) target bundleno = 1582 (0x62e), region = 70 }
  0x4e   : > { %v675_v32 = vld [vmem:[%s6213_s3] sm:$0xff]  ;;  %v676_v33 = vld [vmem:[%s6213_s3 + $0x8] sm:$0xff]  ;;  %s3945_s8 = sshll.u32 %s3938_s18, 4  ;;  %v892_v34 = vld [vmem:[%s6213_s3 + $0x18] sm:$0xff]  ;;  %vm682_vm0 = vcmask 130048   ;;  %s605_s25 = sand.u32 1, %s5039_s15  }
  0x4f   : > { %v4919_v35 = vpack.c.bf16 %v676_v33, %v675_v32  ;;  %p641_p8 = scmp.lt.s32.totalorder %s3945_s8, 31  ;;  %v893_v36 = vld [vmem:[%s6213_s3 + $0x20] sm:$0xff]  ;;  %v894_v54 = vld [vmem:[%s6213_s3 + $0x28] sm:$0xff]  ;;  %v895_v55 = vld [vmem:[%s6213_s3 + $0x30] sm:$0xff]  ;;  %s5000_s26 = smul.u32 768, %s605_s25  ;;  %vm1117_vm1 = vcmask 64512  }
  0x50   : > { %v4923_v37 = vpack.c.bf16 %v893_v36, %v892_v34  ;;  %v4927_v56 = vpack.c.bf16 %v895_v55, %v894_v54  ;;  %v5370_v57 = vld [vmem:[%s6213_s3 + $0x40] sm:$0xff]  ;;  %vm901_vm2 = vcmask 261120   ;;  %vm3211_vm3 = vcmask 1043456  }
  0x51   : > { %4920 = vmatprep.subr.bf16.mxu0 %v4919_v35  ;;  %s6253_s8 = smov (!%p641_p8, %s3945_s8), 31  ;;  %s5374_s29 = scalar_lea.vmem [#allocation2], %s5000_s26  ;;  %vm3162_vm4 = vcmask 31744   ;;  %vm3426_vm5 = vcmask 523264  }
  0x52   : > { %4922 = vmatpush3.bf16.msra.mxu0 %v4919_v35  ;;  %4924 = vmatprep.subr.bf16.mxu1 %v4923_v37  ;;  %s5320_s13 = sshll.u32 %s6253_s8, 3  ;;  %v1097_v58 = vld [vmem:[%s5374_s29] sm:$0xff]  ;;  %v1098_v59 = vld [vmem:[%s5374_s29 + $0x8] sm:$0xff]  ;;  %v1099_v60 = vld [vmem:[%s5374_s29 + $0x10] sm:$0xff] }
  0x53   : > { %4926 = vmatpush3.bf16.msra.mxu1 %v4923_v37  ;;  %s5326_s18 = scalar_lea.vmem %s6210_s0, %s5320_s13  ;;  %4581 = vmatprep.subr.mxu0 %v5370_v57  ;;  %v1100_v61 = vld [vmem:[%s5374_s29 + $0x18] sm:$0xff]  ;;  %v1101_v62 = vld [vmem:[%s5374_s29 + $0x20] sm:$0xff]  ;;  %v1102_v63 = vld [vmem:[%s5374_s29 + $0x28] sm:$0xff]  ;;  %s6093_s15 = scalar_lea.vmem %s6212_s2, %s5320_s13 }
  0x54   : > { %v659_v38 = vld [vmem:[%s5326_s18] sm:$0xff]  ;;  %v660_v39 = vld [vmem:[%s5326_s18 + $0x8] sm:$0xff]  ;;  %v661_v40 = vld [vmem:[%s5326_s18 + $0x10] sm:$0xff]  ;;  %4928 = vmatprep.subr.bf16.mxu1 %v4927_v56  ;;  %s6182_s20 = scalar_lea.vmem %s6214_s4, %s5320_s13 }
  0x55   : > { %4525 = vmatprep.mubr.msk.f32.mxu0 %vm682_vm0, %v659_v38  ;;  %v662_v41 = vld [vmem:[%s5326_s18 + $0x18] sm:$0xff]  ;;  %v663_v42 = vld [vmem:[%s5326_s18 + $0x20] sm:$0xff]  ;;  %v664_v43 = vld [vmem:[%s5326_s18 + $0x28] sm:$0xff] }
  0x56   : > { %4526 = vmatmul.mubr.msk.f32.vlgmr.msra.gmra.mrb[0].mxu0 %vm682_vm0, %v660_v39  ;;  %v665_v44 = vld [vmem:[%s5326_s18 + $0x30] sm:$0xff]  ;;  %v666_v45 = vld [vmem:[%s5326_s18 + $0x38] sm:$0xff]  ;;  %v667_v46 = vld [vmem:[%s5326_s18 + $0x40] sm:$0xff] }
  0x57   : > { %4528 = vmatprep.mubr.msk.f32.mxu0 %vm682_vm0, %v661_v40  ;;  %v668_v47 = vld [vmem:[%s5326_s18 + $0x48] sm:$0xff]  ;;  %v669_v48 = vld [vmem:[%s5326_s18 + $0x50] sm:$0xff]  ;;  %v670_v49 = vld [vmem:[%s5326_s18 + $0x58] sm:$0xff]  ;;  %4930 = vmatpush3.bf16.msra.mxu1 %v4927_v56 }
  0x58   : > { %v671_v50 = vld [vmem:[%s5326_s18 + $0x60] sm:$0xff]  ;;  %v672_v51 = vld [vmem:[%s5326_s18 + $0x68] sm:$0xff]  ;;  %v673_v52 = vld [vmem:[%s5326_s18 + $0x70] sm:$0xff]  ;;  %4607 = vmatprep.subr.mxu1 %v5370_v57  ;;  %4582 = vmatpush3.msra.mxu0 %v5370_v57 }
  0x59   : > { %v674_v53 = vld [vmem:[%s5326_s18 + $0x78] sm:$0xff]  ;;  %4633 = vmatprep.subr.mxu0 %v5370_v57  ;;  %v1103_v0 = vld [vmem:[%s5374_s29 + $0x30] sm:$0xff]  ;;  %v1105_v2 = vld [vmem:[%s5374_s29 + $0x40] sm:$0xff] }
  0x5a   : > { %4529 = vmatmul.mubr.msk.f32.gmra.mrb[2].mxu0 %vm682_vm0, %v662_v41  ;;  %v1104_v1 = vld [vmem:[%s5374_s29 + $0x38] sm:$0xff]  ;;  %v1106_v3 = vld [vmem:[%s5374_s29 + $0x48] sm:$0xff]  ;;  %v1107_v4 = vld [vmem:[%s5374_s29 + $0x50] sm:$0xff] }
  0x5b   : > { %4531 = vmatprep.mubr.msk.f32.mxu0 %vm682_vm0, %v663_v42  ;;  %v1108_v5 = vld [vmem:[%s5374_s29 + $0x58] sm:$0xff]  ;;  %v1109_v6 = vld [vmem:[%s5374_s29 + $0x60] sm:$0xff]  ;;  %v1110_v7 = vld [vmem:[%s5374_s29 + $0x68] sm:$0xff] }
  0x5c   : > { %v1111_v8 = vld [vmem:[%s5374_s29 + $0x70] sm:$0xff]  ;;  %v1112_v9 = vld [vmem:[%s5374_s29 + $0x78] sm:$0xff]  ;;  %v4034_v10 = vld [vmem:[%s5374_s29 + $0x100] sm:$0xff] }
  0x5d   : > { %v4035_v11 = vld [vmem:[%s5374_s29 + $0x108] sm:$0xff]  ;;  %v4036_v12 = vld [vmem:[%s5374_s29 + $0x110] sm:$0xff]  ;;  %v4037_v13 = vld [vmem:[%s5374_s29 + $0x118] sm:$0xff] }
  0x5e   : > { %4532 = vmatmul.mubr.msk.f32.gmra.mrb[4].mxu0 %vm682_vm0, %v664_v43  ;;  %v4038_v14 = vld [vmem:[%s5374_s29 + $0x120] sm:$0xff]  ;;  %v4039_v15 = vld [vmem:[%s5374_s29 + $0x128] sm:$0xff]  ;;  %v4040_v16 = vld [vmem:[%s5374_s29 + $0x130] sm:$0xff] }
  0x5f   : > { %4534 = vmatprep.mubr.msk.f32.mxu0 %vm682_vm0, %v665_v44  ;;  %v4041_v17 = vld [vmem:[%s5374_s29 + $0x138] sm:$0xff]  ;;  %v4042_v18 = vld [vmem:[%s5374_s29 + $0x140] sm:$0xff]  ;;  %v4043_v19 = vld [vmem:[%s5374_s29 + $0x148] sm:$0xff] }
  0x60   : > { %v4044_v20 = vld [vmem:[%s5374_s29 + $0x150] sm:$0xff]  ;;  %v4045_v21 = vld [vmem:[%s5374_s29 + $0x158] sm:$0xff]  ;;  %v4046_v22 = vld [vmem:[%s5374_s29 + $0x160] sm:$0xff] }
  0x61   : > { %v4047_v23 = vld [vmem:[%s5374_s29 + $0x168] sm:$0xff]  ;;  %v4048_v24 = vld [vmem:[%s5374_s29 + $0x170] sm:$0xff]  ;;  %v4049_v25 = vld [vmem:[%s5374_s29 + $0x178] sm:$0xff] }
  0x62   : > { %4535 = vmatmul.mubr.msk.f32.gmra.mrb[6].mxu0 %vm682_vm0, %v666_v45  ;;  %v4098_v26 = vld [vmem:[%s5374_s29 + $0x200] sm:$0xff]  ;;  %v4099_v27 = vld [vmem:[%s5374_s29 + $0x208] sm:$0xff]  ;;  %v4100_v28 = vld [vmem:[%s5374_s29 + $0x210] sm:$0xff] }
  0x63   : > { %4537 = vmatprep.mubr.msk.f32.mxu0 %vm682_vm0, %v667_v46  ;;  %v4101_v29 = vld [vmem:[%s5374_s29 + $0x218] sm:$0xff]  ;;  %v4102_v30 = vld [vmem:[%s5374_s29 + $0x220] sm:$0xff]  ;;  %v4103_v31 = vld [vmem:[%s5374_s29 + $0x228] sm:$0xff] }
  0x64   : > { %v4104_v32 = vld [vmem:[%s5374_s29 + $0x230] sm:$0xff]  ;;  %v4105_v33 = vld [vmem:[%s5374_s29 + $0x238] sm:$0xff]  ;;  %v4106_v34 = vld [vmem:[%s5374_s29 + $0x240] sm:$0xff] }
  0x65   : > { %v4107_v35 = vld [vmem:[%s5374_s29 + $0x248] sm:$0xff]  ;;  %v4108_v36 = vld [vmem:[%s5374_s29 + $0x250] sm:$0xff]  ;;  %v4109_v37 = vld [vmem:[%s5374_s29 + $0x258] sm:$0xff] }
  0x66   : > { %4538 = vmatmul.mubr.msk.f32.gmra.mrb[8].mxu0 %vm682_vm0, %v668_v47  ;;  %v4110_v38 = vld [vmem:[%s5374_s29 + $0x260] sm:$0xff]  ;;  %v4111_v39 = vld [vmem:[%s5374_s29 + $0x268] sm:$0xff]  ;;  %v4112_v40 = vld [vmem:[%s5374_s29 + $0x270] sm:$0xff] }
  0x67   : > { %4540 = vmatprep.mubr.msk.f32.mxu0 %vm682_vm0, %v669_v48  ;;  %v4113_v41 = vld [vmem:[%s5374_s29 + $0x278] sm:$0xff]  ;;  %v3951_v42 = vld [vmem:[%s6213_s3 + $0x10] ss:$0 sm:$0xff] }
  0x6a   : > { %4541 = vmatmul.mubr.msk.f32.gmra.mrb[10].mxu0 %vm682_vm0, %v670_v49 }
  0x6b   : > { %4543 = vmatprep.mubr.msk.f32.mxu0 %vm682_vm0, %v671_v50 }
  0x6e   : > { %4544 = vmatmul.mubr.msk.f32.gmra.mrb[12].mxu0 %vm682_vm0, %v672_v51 }
  0x6f   : > { %4546 = vmatprep.mubr.msk.f32.mxu0 %vm682_vm0, %v673_v52 }
  0x72   : > { %4547 = vmatmul.mubr.msk.f32.gmra.mrb[14].mxu0 %vm682_vm0, %v674_v53 }
  0x73   : > { %4583 = vmatprep.mubr.msk.f32.mxu0 %vm1117_vm1, %v1097_v58 }
  0x76   : > { %4584 = vmatmul.mubr.msk.f32.vlgmr.msra.gmra.mrb[16].mxu0 %vm1117_vm1, %v1098_v59 }
  0x77   : > { %4634 = vmatpush3.msra.mxu0 %v5370_v57  ;;  %4586 = vmatprep.mubr.msk.f32.mxu0 %vm1117_vm1, %v1099_v60 }
  0x78   : > { %4685 = vmatprep.subr.mxu0 %v5370_v57 }
  0x7a   : > { %4587 = vmatmul.mubr.msk.f32.gmra.mrb[18].mxu0 %vm1117_vm1, %v1100_v61 }
  0x7b   : > { %4589 = vmatprep.mubr.msk.f32.mxu0 %vm1117_vm1, %v1101_v62 }
  0x7e   : > { %4590 = vmatmul.mubr.msk.f32.gmra.mrb[20].mxu0 %vm1117_vm1, %v1102_v63 }
  0x7f   : > { %4592 = vmatprep.mubr.msk.f32.mxu0 %vm1117_vm1, %v1103_v0 }
  0x82   : > { %4593 = vmatmul.mubr.msk.f32.gmra.mrb[22].mxu0 %vm1117_vm1, %v1104_v1 }
  0x83   : > { %4595 = vmatprep.mubr.msk.f32.mxu0 %vm1117_vm1, %v1105_v2 }
  0x86   : > { %4596 = vmatmul.mubr.msk.f32.gmra.mrb[24].mxu0 %vm1117_vm1, %v1106_v3 }
  0x87   : > { %4598 = vmatprep.mubr.msk.f32.mxu0 %vm1117_vm1, %v1107_v4 }
  0x8a   : > { %4599 = vmatmul.mubr.msk.f32.gmra.mrb[26].mxu0 %vm1117_vm1, %v1108_v5 }
  0x8b   : > { %4601 = vmatprep.mubr.msk.f32.mxu0 %vm1117_vm1, %v1109_v6 }
  0x8e   : > { %4602 = vmatmul.mubr.msk.f32.gmra.mrb[28].mxu0 %vm1117_vm1, %v1110_v7 }
  0x8f   : > { %4604 = vmatprep.mubr.msk.f32.mxu0 %vm1117_vm1, %v1111_v8 }
  0x92   : > { %4605 = vmatmul.mubr.msk.f32.gmra.mrb[30].mxu0 %vm1117_vm1, %v1112_v9 }
  0x93   : > { %4635 = vmatprep.mubr.msk.f32.mxu0 %vm1117_vm1, %v4034_v10 }
  0x96   : > { %4636 = vmatmul.mubr.msk.f32.vlgmr.msra.gmra.mrb[32].mxu0 %vm1117_vm1, %v4035_v11 }
  0x97   : > { %4686 = vmatpush3.msra.mxu0 %v5370_v57  ;;  %4638 = vmatprep.mubr.msk.f32.mxu0 %vm1117_vm1, %v4036_v12 }
  0x9a   : > { %4639 = vmatmul.mubr.msk.f32.gmra.mrb[34].mxu0 %vm1117_vm1, %v4037_v13 }
  0x9b   : > { %4641 = vmatprep.mubr.msk.f32.mxu0 %vm1117_vm1, %v4038_v14 }
  0x9e   : > { %4642 = vmatmul.mubr.msk.f32.gmra.mrb[36].mxu0 %vm1117_vm1, %v4039_v15 }
  0x9f   : > { %4644 = vmatprep.mubr.msk.f32.mxu0 %vm1117_vm1, %v4040_v16 }
  0xa2   : > { %4645 = vmatmul.mubr.msk.f32.gmra.mrb[38].mxu0 %vm1117_vm1, %v4041_v17 }
  0xa3   : > { %4647 = vmatprep.mubr.msk.f32.mxu0 %vm1117_vm1, %v4042_v18 }
  0xa6   : > { %4648 = vmatmul.mubr.msk.f32.gmra.mrb[40].mxu0 %vm1117_vm1, %v4043_v19 }
  0xa7   : > { %4650 = vmatprep.mubr.msk.f32.mxu0 %vm1117_vm1, %v4044_v20 }
  0xaa   : > { %4651 = vmatmul.mubr.msk.f32.gmra.mrb[42].mxu0 %vm1117_vm1, %v4045_v21 }
  0xab   : > { %4653 = vmatprep.mubr.msk.f32.mxu0 %vm1117_vm1, %v4046_v22 }
  0xae   : > { %4654 = vmatmul.mubr.msk.f32.gmra.mrb[44].mxu0 %vm1117_vm1, %v4047_v23 }
  0xaf   : > { %4656 = vmatprep.mubr.msk.f32.mxu0 %vm1117_vm1, %v4048_v24 }
  0xb2   : > { %4657 = vmatmul.mubr.msk.f32.gmra.mrb[46].mxu0 %vm1117_vm1, %v4049_v25 }
  0xb3   : > { %4687 = vmatprep.mubr.msk.f32.mxu0 %vm1117_vm1, %v4098_v26 }
  0xb6   : > { %4688 = vmatmul.mubr.msk.f32.vlgmr.msra.gmra.mrb[48].mxu0 %vm1117_vm1, %v4099_v27 }
  0xb7   : > { %4690 = vmatprep.mubr.msk.f32.mxu0 %vm1117_vm1, %v4100_v28  ;;  %v4002_v28 = vld [vmem:[%s5374_s29 + $0x80] sm:$0xff] }
  0xba   : > { %4691 = vmatmul.mubr.msk.f32.gmra.mrb[50].mxu0 %vm1117_vm1, %v4101_v29  ;;  %v4003_v29 = vld [vmem:[%s5374_s29 + $0x88] sm:$0xff] }
  0xbb   : > { %4693 = vmatprep.mubr.msk.f32.mxu0 %vm1117_vm1, %v4102_v30  ;;  %v4004_v30 = vld [vmem:[%s5374_s29 + $0x90] sm:$0xff] }
  0xbe   : > { %4694 = vmatmul.mubr.msk.f32.gmra.mrb[52].mxu0 %vm1117_vm1, %v4103_v31  ;;  %v4005_v31 = vld [vmem:[%s5374_s29 + $0x98] sm:$0xff] }
  0xbf   : > { %4696 = vmatprep.mubr.msk.f32.mxu0 %vm1117_vm1, %v4104_v32  ;;  %v4006_v32 = vld [vmem:[%s5374_s29 + $0xa0] sm:$0xff] }
  0xc2   : > { %4697 = vmatmul.mubr.msk.f32.gmra.mrb[54].mxu0 %vm1117_vm1, %v4105_v33  ;;  %v4007_v33 = vld [vmem:[%s5374_s29 + $0xa8] sm:$0xff] }
  0xc3   : > { %4699 = vmatprep.mubr.msk.f32.mxu0 %vm1117_vm1, %v4106_v34  ;;  %v4008_v34 = vld [vmem:[%s5374_s29 + $0xb0] sm:$0xff] }
  0xc6   : > { %4700 = vmatmul.mubr.msk.f32.gmra.mrb[56].mxu0 %vm1117_vm1, %v4107_v35  ;;  %v4009_v35 = vld [vmem:[%s5374_s29 + $0xb8] sm:$0xff] }
  0xc7   : > { %4702 = vmatprep.mubr.msk.f32.mxu0 %vm1117_vm1, %v4108_v36  ;;  %v4010_v36 = vld [vmem:[%s5374_s29 + $0xc0] sm:$0xff] }
  0xca   : > { %4703 = vmatmul.mubr.msk.f32.gmra.mrb[58].mxu0 %vm1117_vm1, %v4109_v37  ;;  %v4011_v37 = vld [vmem:[%s5374_s29 + $0xc8] sm:$0xff] }
  0xcb   : > { %4705 = vmatprep.mubr.msk.f32.mxu0 %vm1117_vm1, %v4110_v38  ;;  %v4012_v38 = vld [vmem:[%s5374_s29 + $0xd0] sm:$0xff] }
  0xce   : > { %4706 = vmatmul.mubr.msk.f32.gmra.mrb[60].mxu0 %vm1117_vm1, %v4111_v39  ;;  %v4013_v39 = vld [vmem:[%s5374_s29 + $0xd8] sm:$0xff] }
  0xcf   : > { %4708 = vmatprep.mubr.msk.f32.mxu0 %vm1117_vm1, %v4112_v40  ;;  %v4014_v40 = vld [vmem:[%s5374_s29 + $0xe0] sm:$0xff] }
  0xd2   : > { %4709 = vmatmul.mubr.msk.f32.gmra.mrb[62].mxu0 %vm1117_vm1, %v4113_v41  ;;  %v4015_v41 = vld [vmem:[%s5374_s29 + $0xe8] sm:$0xff] }
 0x129   : > { %v4527_v43 = vpop.f32.mrb[0].mxu0 }
 0x12a   : > { %v803_v44 = vadd.f32 %v4527_v43, %v3951_v42  ;;  %v797_v45 = vpop.f32.mrb[1].mxu0  ;;  %v4017_v43 = vld [vmem:[%s5374_s29 + $0xf8] sm:$0xff] }
 0x12b   : > { %v798_v46 = vadd.f32 %v3951_v42, %v797_v45  ;;  %v4067_v45 = vld [vmem:[%s5374_s29 + $0x188] sm:$0xff] }
 0x12c   : > { %v877_v49 = vmax.f32 %v803_v44, 0.0  ;;  %v4066_v44 = vld [vmem:[%s5374_s29 + $0x180] sm:$0xff] }
 0x12d   : > { %v876_v47 = vmax.f32 %v798_v46, 0.0  ;;  %v4530_v48 = vpop.f32.mrb[2].mxu0  ;;  %v4068_v46 = vld [vmem:[%s5374_s29 + $0x190] sm:$0xff] }
 0x12e   : > { %v813_v50 = vadd.f32 %v4530_v48, %v3951_v42  ;;  %v807_v51 = vpop.f32.mrb[3].mxu0  ;;  %v4070_v48 = vld [vmem:[%s5374_s29 + $0x1a0] sm:$0xff] }
 0x12f   : > { %v808_v52 = vadd.f32 %v3951_v42, %v807_v51  ;;  %4557 = vmatprep.mubr.msk.f32.mxu1 %vm901_vm2, %v876_v47  ;;  %v4069_v47 = vld [vmem:[%s5374_s29 + $0x198] sm:$0xff] }
 0x130   : > { %4558 = vmatmul.mubr.msk.f32.vlgmr.msra.gmra.mrb[0].mxu1 %vm901_vm2, %v877_v49  ;;  %v879_v55 = vmax.f32 %v813_v50, 0.0  ;;  %v4071_v49 = vld [vmem:[%s5374_s29 + $0x1a8] sm:$0xff]  ;;  %v4072_v50 = vld [vmem:[%s5374_s29 + $0x1b0] sm:$0xff]  ;;  %v4073_v51 = vld [vmem:[%s5374_s29 + $0x1b8] sm:$0xff] }
 0x131   : > { %v878_v53 = vmax.f32 %v808_v52, 0.0  ;;  %4608 = vmatpush3.msra.mxu1 %v5370_v57  ;;  %v4533_v54 = vpop.f32.mrb[4].mxu0  ;;  %v4075_v52 = vld [vmem:[%s5374_s29 + $0x1c8] sm:$0xff] }
 0x132   : > { %v823_v56 = vadd.f32 %v4533_v54, %v3951_v42  ;;  %v817_v58 = vpop.f32.mrb[5].mxu0  ;;  %4659 = vmatprep.subr.mxu1 %v5370_v57  ;;  %v4077_v54 = vld [vmem:[%s5374_s29 + $0x1d8] sm:$0xff] }
 0x133   : > { %v818_v59 = vadd.f32 %v3951_v42, %v817_v58  ;;  %4560 = vmatprep.mubr.msk.f32.mxu1 %vm901_vm2, %v878_v53  ;;  %v4076_v53 = vld [vmem:[%s5374_s29 + $0x1d0] sm:$0xff] }
 0x134   : > { %4561 = vmatmul.mubr.msk.f32.gmra.mrb[2].mxu1 %vm901_vm2, %v879_v55  ;;  %v881_v62 = vmax.f32 %v823_v56, 0.0  ;;  %v4078_v55 = vld [vmem:[%s5374_s29 + $0x1e0] sm:$0xff]  ;;  %v4079_v56 = vld [vmem:[%s5374_s29 + $0x1e8] sm:$0xff]  ;;  %v4080_v58 = vld [vmem:[%s5374_s29 + $0x1f0] sm:$0xff] }
 0x135   : > { %v880_v60 = vmax.f32 %v818_v59, 0.0  ;;  %v4536_v61 = vpop.f32.mrb[6].mxu0  ;;  %v4081_v59 = vld [vmem:[%s5374_s29 + $0x1f8] sm:$0xff] }
 0x136   : > { %v833_v63 = vadd.f32 %v4536_v61, %v3951_v42  ;;  %v827_v0 = vpop.f32.mrb[7].mxu0  ;;  %v4131_v61 = vld [vmem:[%s5374_s29 + $0x288] sm:$0xff] }
 0x137   : > { %v828_v1 = vadd.f32 %v3951_v42, %v827_v0  ;;  %4563 = vmatprep.mubr.msk.f32.mxu1 %vm901_vm2, %v880_v60  ;;  %v4130_v60 = vld [vmem:[%s5374_s29 + $0x280] sm:$0xff] }
 0x138   : > { %4564 = vmatmul.mubr.msk.f32.gmra.mrb[4].mxu1 %vm901_vm2, %v881_v62  ;;  %v883_v4 = vmax.f32 %v833_v63, 0.0  ;;  %v4132_v62 = vld [vmem:[%s5374_s29 + $0x290] sm:$0xff]  ;;  %v4133_v63 = vld [vmem:[%s5374_s29 + $0x298] sm:$0xff]  ;;  %v4134_v0 = vld [vmem:[%s5374_s29 + $0x2a0] sm:$0xff] }
 0x139   : > { %v882_v2 = vmax.f32 %v828_v1, 0.0  ;;  %v4539_v3 = vpop.f32.mrb[8].mxu0  ;;  %v4135_v1 = vld [vmem:[%s5374_s29 + $0x2a8] sm:$0xff] }
 0x13a   : > { %v843_v5 = vadd.f32 %v4539_v3, %v3951_v42  ;;  %v837_v6 = vpop.f32.mrb[9].mxu0  ;;  %v4136_v3 = vld [vmem:[%s5374_s29 + $0x2b0] sm:$0xff] }
 0x13b   : > { %v838_v7 = vadd.f32 %v3951_v42, %v837_v6  ;;  %4566 = vmatprep.mubr.msk.f32.mxu1 %vm901_vm2, %v882_v2 }
 0x13c   : > { %4567 = vmatmul.mubr.msk.f32.gmra.mrb[6].mxu1 %vm901_vm2, %v883_v4  ;;  %v885_v10 = vmax.f32 %v843_v5, 0.0 }
 0x13d   : > { %v884_v8 = vmax.f32 %v838_v7, 0.0  ;;  %v4542_v9 = vpop.f32.mrb[10].mxu0  ;;  %v4137_v7 = vld [vmem:[%s5374_s29 + $0x2b8] sm:$0xff] }
 0x13e   : > { %v853_v11 = vadd.f32 %v4542_v9, %v3951_v42  ;;  %v847_v12 = vpop.f32.mrb[11].mxu0  ;;  %v4138_v9 = vld [vmem:[%s5374_s29 + $0x2c0] sm:$0xff] }
 0x13f   : > { %v848_v13 = vadd.f32 %v3951_v42, %v847_v12  ;;  %4569 = vmatprep.mubr.msk.f32.mxu1 %vm901_vm2, %v884_v8 }
 0x140   : > { %4570 = vmatmul.mubr.msk.f32.gmra.mrb[8].mxu1 %vm901_vm2, %v885_v10  ;;  %v887_v16 = vmax.f32 %v853_v11, 0.0 }
 0x141   : > { %v886_v14 = vmax.f32 %v848_v13, 0.0  ;;  %v4545_v15 = vpop.f32.mrb[12].mxu0  ;;  %v4139_v13 = vld [vmem:[%s5374_s29 + $0x2c8] sm:$0xff] }
 0x142   : > { %v863_v17 = vadd.f32 %v4545_v15, %v3951_v42  ;;  %v857_v18 = vpop.f32.mrb[13].mxu0  ;;  %v4140_v15 = vld [vmem:[%s5374_s29 + $0x2d0] sm:$0xff] }
 0x143   : > { %v858_v19 = vadd.f32 %v3951_v42, %v857_v18  ;;  %4572 = vmatprep.mubr.msk.f32.mxu1 %vm901_vm2, %v886_v14 }
 0x144   : > { %4573 = vmatmul.mubr.msk.f32.gmra.mrb[10].mxu1 %vm901_vm2, %v887_v16  ;;  %v889_v22 = vmax.f32 %v863_v17, 0.0 }
 0x145   : > { %v888_v20 = vmax.f32 %v858_v19, 0.0  ;;  %v4548_v21 = vpop.f32.mrb[14].mxu0  ;;  %v4141_v19 = vld [vmem:[%s5374_s29 + $0x2d8] sm:$0xff] }
 0x146   : > { %v873_v23 = vadd.f32 %v4548_v21, %v3951_v42  ;;  %v867_v24 = vpop.f32.mrb[15].mxu0  ;;  %v4142_v21 = vld [vmem:[%s5374_s29 + $0x2e0] sm:$0xff] }
 0x147   : > { %v868_v25 = vadd.f32 %v3951_v42, %v867_v24  ;;  %4575 = vmatprep.mubr.msk.f32.mxu1 %vm901_vm2, %v888_v20  ;;  %v4016_v42 = vld [vmem:[%s5374_s29 + $0xf0] sm:$0xff] }
 0x148   : > { %4576 = vmatmul.mubr.msk.f32.gmra.mrb[12].mxu1 %vm901_vm2, %v889_v22  ;;  %v891_v27 = vmax.f32 %v873_v23, 0.0 }
 0x149   : > { %v890_v26 = vmax.f32 %v868_v25, 0.0  ;;  %v5576_v2 = vpop.f32.mrb[16].mxu0  ;;  %v4143_v25 = vld [vmem:[%s5374_s29 + $0x2e8] sm:$0xff] }
 0x14a   : > { %v5579_v4 = vpop.f32.mrb[17].mxu0 }
 0x14b   : > { %4578 = vmatprep.mubr.msk.f32.mxu1 %vm901_vm2, %v890_v26 }
 0x14c   : > { %4579 = vmatmul.mubr.msk.f32.gmra.mrb[14].mxu1 %vm901_vm2, %v891_v27  ;;  %v4144_v27 = vld [vmem:[%s5374_s29 + $0x2f0] sm:$0xff] }
 0x14d   : > { %4609 = vmatprep.mubr.msk.f32.mxu1 %vm1117_vm1, %v4002_v28  ;;  %v5581_v5 = vpop.f32.mrb[18].mxu0 }
 0x14e   : > { %v5584_v6 = vpop.f32.mrb[19].mxu0 }
 0x150   : > { %4610 = vmatmul.mubr.msk.f32.vlgmr.msra.gmra.mrb[16].mxu1 %vm1117_vm1, %v4003_v29  ;;  %v4145_v29 = vld [vmem:[%s5374_s29 + $0x2f8] sm:$0xff] }
 0x151   : > { %4660 = vmatpush3.msra.mxu1 %v5370_v57  ;;  %4612 = vmatprep.mubr.msk.f32.mxu1 %vm1117_vm1, %v4004_v30  ;;  %v5588_v8 = vpop.f32.mrb[20].mxu0 }
 0x152   : > { %4711 = vmatprep.subr.mxu1 %v5370_v57  ;;  %v5591_v10 = vpop.f32.mrb[21].mxu0 }
 0x154   : > { %4613 = vmatmul.mubr.msk.f32.gmra.mrb[18].mxu1 %vm1117_vm1, %v4005_v31 }
 0x155   : > { %4615 = vmatprep.mubr.msk.f32.mxu1 %vm1117_vm1, %v4006_v32  ;;  %v5593_v11 = vpop.f32.mrb[22].mxu0 }
 0x156   : > { %v5596_v12 = vpop.f32.mrb[23].mxu0 }
 0x158   : > { %4616 = vmatmul.mubr.msk.f32.gmra.mrb[20].mxu1 %vm1117_vm1, %v4007_v33 }
 0x159   : > { %4618 = vmatprep.mubr.msk.f32.mxu1 %vm1117_vm1, %v4008_v34  ;;  %v5600_v14 = vpop.f32.mrb[24].mxu0 }
 0x15a   : > { %v5603_v16 = vpop.f32.mrb[25].mxu0 }
 0x15c   : > { %4619 = vmatmul.mubr.msk.f32.gmra.mrb[22].mxu1 %vm1117_vm1, %v4009_v35 }
 0x15d   : > { %4621 = vmatprep.mubr.msk.f32.mxu1 %vm1117_vm1, %v4010_v36  ;;  %v5605_v17 = vpop.f32.mrb[26].mxu0 }
 0x15e   : > { %v5608_v18 = vpop.f32.mrb[27].mxu0 }
 0x160   : > { %4622 = vmatmul.mubr.msk.f32.gmra.mrb[24].mxu1 %vm1117_vm1, %v4011_v37 }
 0x161   : > { %4624 = vmatprep.mubr.msk.f32.mxu1 %vm1117_vm1, %v4012_v38  ;;  %v5612_v20 = vpop.f32.mrb[28].mxu0 }
 0x162   : > { %v5615_v22 = vpop.f32.mrb[29].mxu0 }
 0x164   : > { %4625 = vmatmul.mubr.msk.f32.gmra.mrb[26].mxu1 %vm1117_vm1, %v4013_v39 }
 0x165   : > { %4627 = vmatprep.mubr.msk.f32.mxu1 %vm1117_vm1, %v4014_v40  ;;  %v5617_v23 = vpop.f32.mrb[30].mxu0 }
 0x166   : > { %v5620_v24 = vpop.f32.mrb[31].mxu0 }
 0x168   : > { %4628 = vmatmul.mubr.msk.f32.gmra.mrb[28].mxu1 %vm1117_vm1, %v4015_v41 }
 0x169   : > { %4630 = vmatprep.mubr.msk.f32.mxu1 %vm1117_vm1, %v4016_v42  ;;  %v5624_v26 = vpop.f32.mrb[32].mxu0 }
 0x16a   : > { %v5627_v28 = vpop.f32.mrb[33].mxu0 }
 0x16c   : > { %4631 = vmatmul.mubr.msk.f32.gmra.mrb[30].mxu1 %vm1117_vm1, %v4017_v43 }
 0x16d   : > { %4661 = vmatprep.mubr.msk.f32.mxu1 %vm1117_vm1, %v4066_v44  ;;  %v5632_v30 = vpop.f32.mrb[34].mxu0 }
 0x16e   : > { %v5634_v31 = vpop.f32.mrb[35].mxu0 }
 0x170   : > { %4662 = vmatmul.mubr.msk.f32.vlgmr.msra.gmra.mrb[32].mxu1 %vm1117_vm1, %v4067_v45 }
 0x171   : > { %4712 = vmatpush3.msra.mxu1 %v5370_v57  ;;  %4664 = vmatprep.mubr.msk.f32.mxu1 %vm1117_vm1, %v4068_v46  ;;  %v4074_v57 = vld [vmem:[%s5374_s29 + $0x1c0] sm:$0xff]  ;;  %v5637_v32 = vpop.f32.mrb[36].mxu0 }
 0x172   : > { %v5639_v33 = vpop.f32.mrb[37].mxu0 }
 0x174   : > { %4665 = vmatmul.mubr.msk.f32.gmra.mrb[34].mxu1 %vm1117_vm1, %v4069_v47 }
 0x175   : > { %4667 = vmatprep.mubr.msk.f32.mxu1 %vm1117_vm1, %v4070_v48  ;;  %v5641_v34 = vpop.f32.mrb[38].mxu0 }
 0x176   : > { %v5643_v35 = vpop.f32.mrb[39].mxu0 }
 0x178   : > { %4668 = vmatmul.mubr.msk.f32.gmra.mrb[36].mxu1 %vm1117_vm1, %v4071_v49 }
 0x179   : > { %4670 = vmatprep.mubr.msk.f32.mxu1 %vm1117_vm1, %v4072_v50  ;;  %v5645_v36 = vpop.f32.mrb[40].mxu0 }
 0x17a   : > { %v5647_v37 = vpop.f32.mrb[41].mxu0 }
 0x17c   : > { %4671 = vmatmul.mubr.msk.f32.gmra.mrb[38].mxu1 %vm1117_vm1, %v4073_v51  ;;  %v2553_v51 = vld [vmem:[%s6213_s3 + $0x50] sm:$0xff] }
 0x17d   : > { %4673 = vmatprep.mubr.msk.f32.mxu1 %vm1117_vm1, %v4074_v57  ;;  %v5649_v38 = vpop.f32.mrb[42].mxu0  ;;  %v2554_v57 = vld [vmem:[%s6213_s3 + $0x58] sm:$0xff] }
 0x17e   : > { %v5651_v39 = vpop.f32.mrb[43].mxu0 }
 0x180   : > { %4674 = vmatmul.mubr.msk.f32.gmra.mrb[40].mxu1 %vm1117_vm1, %v4075_v52 }
 0x181   : > { %4676 = vmatprep.mubr.msk.f32.mxu1 %vm1117_vm1, %v4076_v53  ;;  %v5653_v40 = vpop.f32.mrb[44].mxu0  ;;  %v4931_v53 = vpack.c.bf16 %v2554_v57, %v2553_v51 }
 0x182   : > { %v5655_v41 = vpop.f32.mrb[45].mxu0 }
 0x183   : > { %4932 = vmatprep.subr.bf16.mxu0 %v4931_v53 }
 0x184   : > { %4677 = vmatmul.mubr.msk.f32.gmra.mrb[42].mxu1 %vm1117_vm1, %v4077_v54  ;;  %4934 = vmatpush3.bf16.msra.mxu0 %v4931_v53 }
 0x185   : > { %4679 = vmatprep.mubr.msk.f32.mxu1 %vm1117_vm1, %v4078_v55  ;;  %v5657_v42 = vpop.f32.mrb[46].mxu0 }
 0x186   : > { %v5659_v43 = vpop.f32.mrb[47].mxu0 }
 0x188   : > { %4680 = vmatmul.mubr.msk.f32.gmra.mrb[44].mxu1 %vm1117_vm1, %v4079_v56 }
 0x189   : > { %4682 = vmatprep.mubr.msk.f32.mxu1 %vm1117_vm1, %v4080_v58  ;;  %v5661_v44 = vpop.f32.mrb[48].mxu0 }
 0x18a   : > { %v5663_v45 = vpop.f32.mrb[49].mxu0 }
 0x18c   : > { %4683 = vmatmul.mubr.msk.f32.gmra.mrb[46].mxu1 %vm1117_vm1, %v4081_v59 }
 0x18d   : > { %4713 = vmatprep.mubr.msk.f32.mxu1 %vm1117_vm1, %v4130_v60  ;;  %v5665_v46 = vpop.f32.mrb[50].mxu0 }
 0x18e   : > { %v5667_v47 = vpop.f32.mrb[51].mxu0 }
 0x190   : > { %4714 = vmatmul.mubr.msk.f32.vlgmr.msra.gmra.mrb[48].mxu1 %vm1117_vm1, %v4131_v61 }
 0x191   : > { %4716 = vmatprep.mubr.msk.f32.mxu1 %vm1117_vm1, %v4132_v62  ;;  %v5669_v48 = vpop.f32.mrb[52].mxu0  ;;  %v2555_v62 = vld [vmem:[%s6213_s3 + $0x60] sm:$0xff] }
 0x192   : > { %v5671_v49 = vpop.f32.mrb[53].mxu0 }
 0x194   : > { %4717 = vmatmul.mubr.msk.f32.gmra.mrb[50].mxu1 %vm1117_vm1, %v4133_v63  ;;  %v2556_v63 = vld [vmem:[%s6213_s3 + $0x68] sm:$0xff] }
 0x195   : > { %4719 = vmatprep.mubr.msk.f32.mxu1 %vm1117_vm1, %v4134_v0  ;;  %v5673_v50 = vpop.f32.mrb[54].mxu0 }
 0x196   : > { %v5681_v52 = vpop.f32.mrb[55].mxu0 }
 0x198   : > { %4720 = vmatmul.mubr.msk.f32.gmra.mrb[52].mxu1 %vm1117_vm1, %v4135_v1  ;;  %v4935_v1 = vpack.c.bf16 %v2556_v63, %v2555_v62 }
 0x199   : > { %4722 = vmatprep.mubr.msk.f32.mxu1 %vm1117_vm1, %v4136_v3  ;;  %v5683_v54 = vpop.f32.mrb[56].mxu0 }
 0x19a   : > { %v5685_v55 = vpop.f32.mrb[57].mxu0  ;;  %4936 = vmatprep.subr.bf16.mxu0 %v4935_v1 }
 0x19b   : > { %4938 = vmatpush3.bf16.msra.mxu0 %v4935_v1 }
 0x19c   : > { %4723 = vmatmul.mubr.msk.f32.gmra.mrb[54].mxu1 %vm1117_vm1, %v4137_v7 }
 0x19d   : > { %4725 = vmatprep.mubr.msk.f32.mxu1 %vm1117_vm1, %v4138_v9  ;;  %v5687_v56 = vpop.f32.mrb[58].mxu0 }
 0x19e   : > { %v5689_v58 = vpop.f32.mrb[59].mxu0 }
 0x1a0   : > { %4726 = vmatmul.mubr.msk.f32.gmra.mrb[56].mxu1 %vm1117_vm1, %v4139_v13 }
 0x1a1   : > { %4728 = vmatprep.mubr.msk.f32.mxu1 %vm1117_vm1, %v4140_v15  ;;  %v5691_v59 = vpop.f32.mrb[60].mxu0  ;;  %v2757_v15 = vld [vmem:[%s6213_s3 + $0x88] sm:$0xff] }
 0x1a2   : > { %v5693_v60 = vpop.f32.mrb[61].mxu0 }
 0x1a4   : > { %4729 = vmatmul.mubr.msk.f32.gmra.mrb[58].mxu1 %vm1117_vm1, %v4141_v19  ;;  %v2758_v19 = vld [vmem:[%s6213_s3 + $0x90] sm:$0xff] }
 0x1a5   : > { %4731 = vmatprep.mubr.msk.f32.mxu1 %vm1117_vm1, %v4142_v21  ;;  %v5695_v61 = vpop.f32.mrb[62].mxu0 }
 0x1a6   : > { %v5703_v0 = vpop.f32.mrb[63].mxu0 }
 0x1a7   : > { %6215 = vst [vmem:[#allocation3_spill] sm:$0xff] %v5703_v0 }
 0x1a8   : > { %4732 = vmatmul.mubr.msk.f32.gmra.mrb[60].mxu1 %vm1117_vm1, %v4143_v25  ;;  %v4939_v25 = vpack.c.bf16 %v2758_v19, %v2757_v15  ;;  %v5742_v15 = vld [vmem:[%s6213_s3 + $0x48] ss:$0 sm:$0xff] }
 0x1a9   : > { %4734 = vmatprep.mubr.msk.f32.mxu1 %vm1117_vm1, %v4144_v27 }
 0x1aa   : > { %4940 = vmatprep.subr.bf16.mxu1 %v4939_v25 }
 0x1ab   : > { %4942 = vmatpush3.bf16.msra.mxu1 %v4939_v25 }
 0x1ac   : > { %4735 = vmatmul.mubr.msk.f32.gmra.mrb[62].mxu1 %vm1117_vm1, %v4145_v29 }
 0x203   : > { %v5705_v3 = vpop.f32.mrb[0].mxu1 }
 0x204   : > { %6216 = vst [vmem:[#allocation4_spill] sm:$0xff] %v5705_v3  ;;  %v5707_v7 = vpop.f32.mrb[1].mxu1 }
 0x205   : > { %6217 = vst [vmem:[#allocation5_spill] sm:$0xff] %v5707_v7  ;;  %v1258_v7 = vadd.f32 %v5588_v8, %v5742_v15 }
 0x207   : > { %v5709_v9 = vpop.f32.mrb[2].mxu1 }
 0x208   : > { %6218 = vst [vmem:[#allocation6_spill] sm:$0xff] %v5709_v9  ;;  %v5711_v13 = vpop.f32.mrb[3].mxu1 }
 0x209   : > { %6219 = vst [vmem:[#allocation7_spill] sm:$0xff] %v5711_v13 }
 0x20b   : > { %v5719_v21 = vpop.f32.mrb[4].mxu1 }
 0x20c   : > { %6220 = vst [vmem:[#allocation8_spill] sm:$0xff] %v5719_v21  ;;  %v5721_v27 = vpop.f32.mrb[5].mxu1 }
 0x20d   : > { %6221 = vst [vmem:[#allocation9_spill] sm:$0xff] %v5721_v27 }
 0x20f   : > { %v5723_v29 = vpop.f32.mrb[6].mxu1 }
 0x210   : > { %6222 = vst [vmem:[#allocation10_spill] sm:$0xff] %v5723_v29  ;;  %v5725_v51 = vpop.f32.mrb[7].mxu1 }
 0x211   : > { %6223 = vst [vmem:[#allocation11_spill] sm:$0xff] %v5725_v51 }
 0x213   : > { %v5727_v57 = vpop.f32.mrb[8].mxu1 }
 0x214   : > { %6224 = vst [vmem:[#allocation12_spill] sm:$0xff] %v5727_v57  ;;  %v5729_v53 = vpop.f32.mrb[9].mxu1  ;;  %v1238_v57 = vadd.f32 %v5576_v2, %v5742_v15 }
 0x215   : > { %6225 = vst [vmem:[#allocation13_spill] sm:$0xff] %v5729_v53  ;;  %v1248_v53 = vadd.f32 %v5581_v5, %v5742_v15  ;;  %v1711_v5 = vadd.f32 %v5742_v15, %v5634_v31  ;;  %v1726_v31 = vadd.f32 %v5637_v32, %v5742_v15  ;;  %v1263_v32 = vadd.f32 %v5742_v15, %v5596_v12 }
 0x216   : > { %v1312_v51 = vmax.f32 %v1238_v57, 0.0  ;;  %v1278_v12 = vadd.f32 %v5600_v14, %v5742_v15 }
 0x217   : > { %v5731_v62 = vpop.f32.mrb[10].mxu1 }
 0x218   : > { %6226 = vst [vmem:[#allocation14_spill] sm:$0xff] %v5731_v62  ;;  %v5733_v63 = vpop.f32.mrb[11].mxu1  ;;  %v1706_v62 = vadd.f32 %v5624_v26, %v5742_v15 }
 0x219   : > { %6227 = vst [vmem:[#allocation15_spill] sm:$0xff] %v5733_v63 }
 0x21a   : > { %v1780_v27 = vmax.f32 %v1706_v62, 0.0  ;;  %v1253_v62 = vadd.f32 %v5742_v15, %v5591_v10  ;;  %v1268_v10 = vadd.f32 %v5593_v11, %v5742_v15 }
 0x21b   : > { %v5735_v1 = vpop.f32.mrb[12].mxu1 }
 0x21c   : > { %6228 = vst [vmem:[#allocation16_spill] sm:$0xff] %v5735_v1  ;;  %v5737_v21 = vpop.f32.mrb[13].mxu1  ;;  %v1233_v1 = vadd.f32 %v5742_v15, %v5579_v4  ;;  %v1716_v4 = vadd.f32 %v5632_v30, %v5742_v15 }
 0x21d   : > { %6229 = vst [vmem:[#allocation17_spill] sm:$0xff] %v5737_v21  ;;  %v1701_v21 = vadd.f32 %v5742_v15, %v5627_v28 }
 0x21e   : > { %v1311_v9 = vmax.f32 %v1233_v1, 0.0  ;;  %v1782_v0 = vmax.f32 %v1716_v4, 0.0  ;;  %v1315_v4 = vmax.f32 %v1253_v62, 0.0  ;;  %v1731_v62 = vadd.f32 %v5742_v15, %v5643_v35 }
 0x21f   : > { %v5744_v19 = vpop.f32.mrb[14].mxu1  ;;  %v1779_v28 = vmax.f32 %v1701_v21, 0.0  ;;  %v1746_v35 = vadd.f32 %v5645_v36, %v5742_v15  ;;  %v1283_v36 = vadd.f32 %v5742_v15, %v5608_v18  ;;  %v1298_v18 = vadd.f32 %v5612_v20, %v5742_v15 }
 0x220   : > { %6230 = vst [vmem:[#allocation18_spill] sm:$0xff] %v5744_v19  ;;  %v5746_v25 = vpop.f32.mrb[15].mxu1 }
 0x221   : > { %6231 = vst [vmem:[#allocation19_spill] sm:$0xff] %v5746_v25  ;;  %v1243_v25 = vadd.f32 %v5742_v15, %v5584_v6 }
 0x223   : > { %v4611_v63 = vpop.f32.mrb[16].mxu1 }
 0x224   : > { %v1464_v19 = vadd.f32 %v4611_v63, %v5742_v15  ;;  %v1458_v29 = vpop.f32.mrb[17].mxu1  ;;  %v1314_v63 = vmax.f32 %v1248_v53, 0.0 }
 0x225   : > { %v1459_v2 = vadd.f32 %v5742_v15, %v1458_v29 }
 0x226   : > { %v1538_v26 = vmax.f32 %v1464_v19, 0.0  ;;  %v1313_v19 = vmax.f32 %v1243_v25, 0.0  ;;  %v1721_v25 = vadd.f32 %v5742_v15, %v5639_v33  ;;  %v1736_v33 = vadd.f32 %v5641_v34, %v5742_v15 }
 0x227   : > { %v1537_v13 = vmax.f32 %v1459_v2, 0.0  ;;  %v4614_v3 = vpop.f32.mrb[18].mxu1  ;;  %v1273_v34 = vadd.f32 %v5742_v15, %v5603_v16  ;;  %v1288_v16 = vadd.f32 %v5605_v17, %v5742_v15 }
 0x228   : > { %v1554_v6 = vadd.f32 %v1538_v26, %v1312_v51  ;;  %v1474_v29 = vadd.f32 %v4614_v3, %v5742_v15  ;;  %v1468_v57 = vpop.f32.mrb[19].mxu1  ;;  %v1781_v51 = vmax.f32 %v1711_v5, 0.0  ;;  %v1316_v26 = vmax.f32 %v1258_v7, 0.0 }
 0x229   : > { %v1553_v30 = vadd.f32 %v1537_v13, %v1311_v9  ;;  %v1469_v1 = vadd.f32 %v5742_v15, %v1468_v57  ;;  %v1784_v57 = vmax.f32 %v1726_v31, 0.0  ;;  %v1317_v31 = vmax.f32 %v1263_v32, 0.0 }
 0x22a   : > { %v5772_v21 = vadd.f32 %v1780_v27, %v1554_v6  ;;  %v1540_v2 = vmax.f32 %v1474_v29, 0.0  ;;  %v1320_v32 = vmax.f32 %v1278_v12, 0.0 }
 0x22b   : > { %v5776_v53 = vadd.f32 %v1779_v28, %v1553_v30  ;;  %v1539_v8 = vmax.f32 %v1469_v1, 0.0  ;;  %v4617_v3 = vpop.f32.mrb[20].mxu1  ;;  %v1318_v1 = vmax.f32 %v1268_v10, 0.0 }
 0x22c   : > { %v1556_v9 = vadd.f32 %v1540_v2, %v1314_v63  ;;  %v1484_v13 = vadd.f32 %v4617_v3, %v5742_v15  ;;  %v1478_v27 = vpop.f32.mrb[21].mxu1  ;;  %v1783_v63 = vmax.f32 %v1721_v25, 0.0 }
 0x22d   : > { %v1555_v28 = vadd.f32 %v1539_v8, %v1313_v19  ;;  %v1479_v6 = vadd.f32 %v5742_v15, %v1478_v27  ;;  %v1741_v27 = vadd.f32 %v5742_v15, %v5647_v37  ;;  %v1756_v37 = vadd.f32 %v5649_v38, %v5742_v15 }
 0x22e   : > { %v5786_v5 = vadd.f32 %v1782_v0, %v1556_v9  ;;  %v1542_v29 = vmax.f32 %v1484_v13, 0.0  ;;  %v1786_v9 = vmax.f32 %v1736_v33, 0.0  ;;  %v1293_v38 = vadd.f32 %v5742_v15, %v5615_v22 }
 0x22f   : > { %v5790_v7 = vadd.f32 %v1781_v51, %v1555_v28  ;;  %v1541_v11 = vmax.f32 %v1479_v6, 0.0  ;;  %v4620_v30 = vpop.f32.mrb[22].mxu1  ;;  %v1308_v22 = vadd.f32 %v5617_v23, %v5742_v15 }
 0x230   : > { %v1558_v19 = vadd.f32 %v1542_v29, %v1316_v26  ;;  %v1494_v0 = vadd.f32 %v4620_v30, %v5742_v15  ;;  %v1488_v2 = vpop.f32.mrb[23].mxu1  ;;  %v1785_v26 = vmax.f32 %v1731_v62, 0.0  ;;  %v1319_v29 = vmax.f32 %v1273_v34, 0.0 }
 0x231   : > { %v1557_v8 = vadd.f32 %v1541_v11, %v1315_v4  ;;  %v1489_v51 = vadd.f32 %v5742_v15, %v1488_v2  ;;  %v1788_v30 = vmax.f32 %v1746_v35, 0.0 }
 0x232   : > { %v5800_v3 = vadd.f32 %v1784_v57, %v1558_v19  ;;  %v1544_v25 = vmax.f32 %v1494_v0, 0.0  ;;  %v1751_v19 = vadd.f32 %v5742_v15, %v5651_v39  ;;  %v1322_v0 = vmax.f32 %v1288_v16, 0.0 }
 0x233   : > { %v5804_v10 = vadd.f32 %v1783_v63, %v1557_v8  ;;  %v1543_v14 = vmax.f32 %v1489_v51, 0.0  ;;  %v4623_v13 = vpop.f32.mrb[24].mxu1  ;;  %v1321_v8 = vmax.f32 %v1283_v36, 0.0  ;;  %v1766_v39 = vadd.f32 %v5653_v40, %v5742_v15 }
 0x234   : > { %v1560_v4 = vadd.f32 %v1544_v25, %v1318_v1  ;;  %v1504_v28 = vadd.f32 %v4623_v13, %v5742_v15  ;;  %v1498_v6 = vpop.f32.mrb[25].mxu1  ;;  %v1787_v1 = vmax.f32 %v1741_v27, 0.0  ;;  %v1789_v13 = vmax.f32 %v1751_v19, 0.0 }
 0x235   : > { %v1559_v57 = vadd.f32 %v1543_v14, %v1317_v31  ;;  %v1499_v33 = vadd.f32 %v5742_v15, %v1498_v6  ;;  %v1790_v14 = vmax.f32 %v1756_v37, 0.0  ;;  %v1324_v16 = vmax.f32 %v1298_v18, 0.0 }
 0x236   : > { %v5814_v11 = vadd.f32 %v1786_v9, %v1560_v4  ;;  %v1546_v63 = vmax.f32 %v1504_v28, 0.0  ;;  %v1303_v40 = vadd.f32 %v5742_v15, %v5620_v24  ;;  %v1326_v18 = vmax.f32 %v1308_v22, 0.0 }
 0x237   : > { %v5818_v62 = vadd.f32 %v1785_v26, %v1559_v57  ;;  %v1545_v17 = vmax.f32 %v1499_v33, 0.0  ;;  %v4626_v12 = vpop.f32.mrb[26].mxu1 }
 0x238   : > { %v1562_v2 = vadd.f32 %v1546_v63, %v1320_v32  ;;  %v1514_v31 = vadd.f32 %v4626_v12, %v5742_v15  ;;  %v1508_v34 = vpop.f32.mrb[27].mxu1  ;;  %v1761_v32 = vadd.f32 %v5742_v15, %v5655_v41  ;;  %v1776_v41 = vadd.f32 %v5657_v42, %v5742_v15 }
 0x239   : > { %v1561_v51 = vadd.f32 %v1545_v17, %v1319_v29  ;;  %v1509_v25 = vadd.f32 %v5742_v15, %v1508_v34  ;;  %v1323_v29 = vmax.f32 %v1293_v38, 0.0  ;;  %v1771_v12 = vadd.f32 %v5742_v15, %v5659_v43 }
 0x23a   : > { %v5828_v9 = vadd.f32 %v1788_v30, %v1562_v2  ;;  %v1548_v35 = vmax.f32 %v1514_v31, 0.0  ;;  %v1792_v30 = vmax.f32 %v1766_v39, 0.0  ;;  %v1791_v17 = vmax.f32 %v1761_v32, 0.0 }
 0x23b   : > { %v5832_v26 = vadd.f32 %v1787_v1, %v1561_v51  ;;  %v1547_v20 = vmax.f32 %v1509_v25, 0.0  ;;  %v4629_v27 = vpop.f32.mrb[28].mxu1  ;;  %v1325_v2 = vmax.f32 %v1303_v40, 0.0  ;;  %v1794_v38 = vmax.f32 %v1776_v41, 0.0 }
 0x23c   : > { %v1564_v4 = vadd.f32 %v1548_v35, %v1322_v0  ;;  %v1524_v28 = vadd.f32 %v4629_v27, %v5742_v15  ;;  %v1518_v6 = vpop.f32.mrb[29].mxu1  ;;  %v2190_v51 = vadd.f32 %v5661_v44, %v5742_v15  ;;  %v1793_v43 = vmax.f32 %v1771_v12, 0.0 }
 0x23d   : > { %v1563_v36 = vadd.f32 %v1547_v20, %v1321_v8  ;;  %v1519_v57 = vadd.f32 %v5742_v15, %v1518_v6  ;;  %v2185_v39 = vadd.f32 %v5742_v15, %v5663_v45  ;;  %v2200_v44 = vadd.f32 %v5665_v46, %v5742_v15 }
 0x23e   : > { %v5842_v33 = vadd.f32 %v1790_v14, %v1564_v4  ;;  %v1550_v63 = vmax.f32 %v1524_v28, 0.0  ;;  %v2264_v28 = vmax.f32 %v2190_v51, 0.0  ;;  %v2195_v45 = vadd.f32 %v5742_v15, %v5667_v47 }
 0x23f   : > { %v5846_v37 = vadd.f32 %v1789_v13, %v1563_v36  ;;  %v1549_v23 = vmax.f32 %v1519_v57, 0.0  ;;  %v4632_v1 = vpop.f32.mrb[30].mxu1  ;;  %v2263_v40 = vmax.f32 %v2185_v39, 0.0  ;;  %v2210_v12 = vadd.f32 %v5669_v48, %v5742_v15 }
 0x240   : > { %v1566_v19 = vadd.f32 %v1550_v63, %v1324_v16  ;;  %v1534_v24 = vadd.f32 %v4632_v1, %v5742_v15  ;;  %v1528_v0 = vpop.f32.mrb[31].mxu1  ;;  %v2266_v1 = vmax.f32 %v2200_v44, 0.0  ;;  %v2265_v47 = vmax.f32 %v2195_v45, 0.0 }
 0x241   : > { %v1565_v31 = vadd.f32 %v1549_v23, %v1323_v29  ;;  %v1529_v34 = vadd.f32 %v5742_v15, %v1528_v0  ;;  %v2220_v51 = vadd.f32 %v5673_v50, %v5742_v15 }
 0x242   : > { %v5852_v8 = vadd.f32 %v1792_v30, %v1566_v19  ;;  %v1552_v42 = vmax.f32 %v1534_v24, 0.0 }
 0x243   : > { %v5856_v25 = vadd.f32 %v1791_v17, %v1565_v31  ;;  %v1551_v35 = vmax.f32 %v1529_v34, 0.0  ;;  %v4663_v14 = vpop.f32.mrb[32].mxu1 }
 0x244   : > { %v1568_v20 = vadd.f32 %v1552_v42, %v1326_v18  ;;  %v1948_v13 = vadd.f32 %v4663_v14, %v5742_v15  ;;  %v1942_v27 = vpop.f32.mrb[33].mxu1 }
 0x245   : > { %v1567_v32 = vadd.f32 %v1551_v35, %v1325_v2  ;;  %v1943_v16 = vadd.f32 %v5742_v15, %v1942_v27 }
 0x246   : > { %v5862_v22 = vadd.f32 %v1794_v38, %v1568_v20  ;;  %v2022_v4 = vmax.f32 %v1948_v13, 0.0  ;;  %v2268_v38 = vmax.f32 %v2210_v12, 0.0 }
 0x247   : > { %v5866_v6 = vadd.f32 %v1793_v43, %v1567_v32  ;;  %v2021_v29 = vmax.f32 %v1943_v16, 0.0  ;;  %v4666_v36 = vpop.f32.mrb[34].mxu1  ;;  %v2270_v16 = vmax.f32 %v2220_v51, 0.0 }
 0x248   : > { %v2038_v57 = vadd.f32 %v2022_v4, %v5772_v21  ;;  %v1958_v63 = vadd.f32 %v4666_v36, %v5742_v15  ;;  %v1952_v30 = vpop.f32.mrb[35].mxu1  ;;  %v2205_v21 = vadd.f32 %v5742_v15, %v5671_v49  ;;  %v2230_v4 = vadd.f32 %v5683_v54, %v5742_v15 }
 0x249   : > { %v2037_v41 = vadd.f32 %v2021_v29, %v5776_v53  ;;  %v1953_v23 = vadd.f32 %v5742_v15, %v1952_v30 }
 0x24a   : > { %v5874_v17 = vadd.f32 %v2264_v28, %v2038_v57  ;;  %v2024_v46 = vmax.f32 %v1958_v63, 0.0  ;;  %v2267_v49 = vmax.f32 %v2205_v21, 0.0  ;;  %v2272_v30 = vmax.f32 %v2230_v4, 0.0 }
 0x24b   : > { %v5878_v19 = vadd.f32 %v2263_v40, %v2037_v41  ;;  %v2023_v24 = vmax.f32 %v1953_v23, 0.0  ;;  %v4669_v0 = vpop.f32.mrb[36].mxu1  ;;  %v2240_v41 = vadd.f32 %v5687_v56, %v5742_v15 }
 0x24c   : > { %v2040_v18 = vadd.f32 %v2024_v46, %v5786_v5  ;;  %v1968_v53 = vadd.f32 %v4669_v0, %v5742_v15  ;;  %v1962_v2 = vpop.f32.mrb[37].mxu1  ;;  %v2215_v5 = vadd.f32 %v5742_v15, %v5681_v52 }
 0x24d   : > { %v2039_v31 = vadd.f32 %v2023_v24, %v5790_v7  ;;  %v1963_v34 = vadd.f32 %v5742_v15, %v1962_v2 }
 0x24e   : > { %v5886_v42 = vadd.f32 %v2266_v1, %v2040_v18  ;;  %v2026_v48 = vmax.f32 %v1968_v53, 0.0  ;;  %v2269_v52 = vmax.f32 %v2215_v5, 0.0  ;;  %v2274_v18 = vmax.f32 %v2240_v41, 0.0 }
 0x24f   : > { %v5890_v35 = vadd.f32 %v2265_v47, %v2039_v31  ;;  %v2025_v43 = vmax.f32 %v1963_v34, 0.0  ;;  %v4672_v14 = vpop.f32.mrb[38].mxu1  ;;  %v2250_v53 = vadd.f32 %v5691_v59, %v5742_v15  ;;  %v2260_v5 = vadd.f32 %v5695_v61, %v5742_v15 }
 0x250   : > { %v2042_v39 = vadd.f32 %v2026_v48, %v5800_v3  ;;  %v1978_v7 = vadd.f32 %v4672_v14, %v5742_v15  ;;  %v1972_v20 = vpop.f32.mrb[39].mxu1  ;;  %v2225_v3 = vadd.f32 %v5742_v15, %v5685_v55 }
 0x251   : > { %v2041_v13 = vadd.f32 %v2025_v43, %v5804_v10  ;;  %v1973_v27 = vadd.f32 %v5742_v15, %v1972_v20  ;;  %v2276_v14 = vmax.f32 %v2250_v53, 0.0 }
 0x252   : > { %v5898_v32 = vadd.f32 %v2268_v38, %v2042_v39  ;;  %v2028_v50 = vmax.f32 %v1978_v7, 0.0  ;;  %v2271_v55 = vmax.f32 %v2225_v3, 0.0 }
 0x253   : > { %v5902_v28 = vadd.f32 %v2267_v49, %v2041_v13  ;;  %v2027_v44 = vmax.f32 %v1973_v27, 0.0  ;;  %v4675_v29 = vpop.f32.mrb[40].mxu1 }
 0x254   : > { %v2044_v40 = vadd.f32 %v2028_v50, %v5814_v11  ;;  %v1988_v10 = vadd.f32 %v4675_v29, %v5742_v15  ;;  %v1982_v36 = vpop.f32.mrb[41].mxu1  ;;  %v2235_v11 = vadd.f32 %v5742_v15, %v5689_v58 }
 0x255   : > { %v2043_v45 = vadd.f32 %v2027_v44, %v5818_v62  ;;  %v1983_v57 = vadd.f32 %v5742_v15, %v1982_v36 }
 0x256   : > { %v5910_v63 = vadd.f32 %v2270_v16, %v2044_v40  ;;  %v2030_v54 = vmax.f32 %v1988_v10, 0.0  ;;  %v2273_v58 = vmax.f32 %v2235_v11, 0.0 }
 0x257   : > { %v5914_v23 = vadd.f32 %v2269_v52, %v2043_v45  ;;  %v2029_v46 = vmax.f32 %v1983_v57, 0.0  ;;  %v4678_v1 = vpop.f32.mrb[42].mxu1  ;;  %v2278_v52 = vmax.f32 %v2260_v5, 0.0 }
 0x258   : > { %v2046_v12 = vadd.f32 %v2030_v54, %v5828_v9  ;;  %v1998_v62 = vadd.f32 %v4678_v1, %v5742_v15  ;;  %v1992_v24 = vpop.f32.mrb[43].mxu1  ;;  %v2245_v9 = vadd.f32 %v5742_v15, %v5693_v60 }
 0x259   : > { %v2045_v47 = vadd.f32 %v2029_v46, %v5832_v26  ;;  %v1993_v0 = vadd.f32 %v5742_v15, %v1992_v24 }
 0x25a   : > { %v5922_v21 = vadd.f32 %v2272_v30, %v2046_v12  ;;  %v2032_v56 = vmax.f32 %v1998_v62, 0.0  ;;  %v2275_v60 = vmax.f32 %v2245_v9, 0.0 }
 0x25b   : > { %v5926_v2 = vadd.f32 %v2271_v55, %v2045_v47  ;;  %v2031_v31 = vmax.f32 %v1993_v0, 0.0  ;;  %v4681_v34 = vpop.f32.mrb[44].mxu1 }
 0x25c   : > { %v2048_v48 = vadd.f32 %v2032_v56, %v5842_v33  ;;  %v2008_v26 = vadd.f32 %v4681_v34, %v5742_v15  ;;  %v2002_v38 = vpop.f32.mrb[45].mxu1  ;;  %v6232_v33 = vld [vmem:[#allocation3_spill] sm:$0xff] }
 0x25d   : > { %v2047_v51 = vadd.f32 %v2031_v31, %v5846_v37  ;;  %v2003_v43 = vadd.f32 %v5742_v15, %v2002_v38  ;;  %v2255_v13 = vadd.f32 %v5742_v15, %v6232_v33 }
 0x25e   : > { %v5934_v49 = vadd.f32 %v2274_v18, %v2048_v48  ;;  %v2034_v59 = vmax.f32 %v2008_v26, 0.0 }
 0x25f   : > { %v5938_v39 = vadd.f32 %v2273_v58, %v2047_v51  ;;  %v2033_v7 = vmax.f32 %v2003_v43, 0.0  ;;  %v4684_v20 = vpop.f32.mrb[46].mxu1  ;;  %v2277_v40 = vmax.f32 %v2255_v13, 0.0 }
 0x260   : > { %v2050_v27 = vadd.f32 %v2034_v59, %v5852_v8  ;;  %v2018_v37 = vadd.f32 %v4684_v20, %v5742_v15  ;;  %v2012_v50 = vpop.f32.mrb[47].mxu1 }
 0x261   : > { %v2049_v16 = vadd.f32 %v2033_v7, %v5856_v25  ;;  %v2013_v4 = vadd.f32 %v5742_v15, %v2012_v50 }
 0x262   : > { %v5946_v44 = vadd.f32 %v2276_v14, %v2050_v27  ;;  %v2036_v61 = vmax.f32 %v2018_v37, 0.0 }
 0x263   : > { %v5948_v29 = vadd.f32 %v2275_v60, %v2049_v16  ;;  %v2035_v3 = vmax.f32 %v2013_v4, 0.0  ;;  %v4715_v10 = vpop.f32.mrb[48].mxu1 }
 0x264   : > { %v2052_v36 = vadd.f32 %v2036_v61, %v5862_v22  ;;  %v2432_v8 = vadd.f32 %v4715_v10, %v5742_v15  ;;  %v2426_v45 = vpop.f32.mrb[49].mxu1 }
 0x265   : > { %v2051_v57 = vadd.f32 %v2035_v3, %v5866_v6  ;;  %v2427_v25 = vadd.f32 %v5742_v15, %v2426_v45 }
 0x266   : > { %v5954_v54 = vadd.f32 %v2278_v52, %v2052_v36  ;;  %v2506_v30 = vmax.f32 %v2432_v8, 0.0 }
 0x267   : > { %v5956_v41 = vadd.f32 %v2277_v40, %v2051_v57  ;;  %v2505_v46 = vmax.f32 %v2427_v25, 0.0  ;;  %v4718_v55 = vpop.f32.mrb[50].mxu1 }
 0x268   : > { %v2522_v1 = vadd.f32 %v2506_v30, %v5874_v17  ;;  %v2442_v11 = vadd.f32 %v4718_v55, %v5742_v15  ;;  %v2436_v12 = vpop.f32.mrb[51].mxu1 }
 0x269   : > { %v2521_v22 = vadd.f32 %v2505_v46, %v5878_v19  ;;  %v2437_v62 = vadd.f32 %v5742_v15, %v2436_v12 }
 0x26a   : > { %v2508_v24 = vmax.f32 %v2442_v11, 0.0  ;;  %v2538_v56 = vmul.f32 0.16666667, %v2522_v1 }
 0x26b   : > { %v2537_v6 = vmul.f32 0.16666667, %v2521_v22  ;;  %v2507_v47 = vmax.f32 %v2437_v62, 0.0  ;;  %v4721_v0 = vpop.f32.mrb[52].mxu1 }
 0x26c   : > { %v2524_v18 = vadd.f32 %v2508_v24, %v5886_v42  ;;  %v2452_v53 = vadd.f32 %v4721_v0, %v5742_v15  ;;  %v2446_v31 = vpop.f32.mrb[53].mxu1 }
 0x26d   : > { %v2523_v58 = vadd.f32 %v2507_v47, %v5890_v35  ;;  %v2447_v17 = vadd.f32 %v5742_v15, %v2446_v31  ;;  %4745 = vmatprep.mubr.msk.f32.mxu0 %vm901_vm2, %v2537_v6 }
 0x26e   : > { %v2510_v34 = vmax.f32 %v2452_v53, 0.0  ;;  %4746 = vmatmul.mubr.msk.f32.vlgmr.msra.gmra.mrb[64].mxu0 %vm901_vm2, %v2538_v56  ;;  %v2540_v26 = vmul.f32 0.16666667, %v2524_v18 }
 0x26f   : > { %v2539_v19 = vmul.f32 0.16666667, %v2523_v58  ;;  %v2509_v9 = vmax.f32 %v2447_v17, 0.0  ;;  %v4724_v48 = vpop.f32.mrb[54].mxu1  ;;  %v3414_v58 = vld [vmem:[%s6213_s3 + $0xb0] sm:$0xff]  ;;  %v3415_v17 = vld [vmem:[%s6213_s3 + $0xb8] sm:$0xff] }
 0x270   : > { %v2526_v38 = vadd.f32 %v2510_v34, %v5898_v32  ;;  %v2462_v42 = vadd.f32 %v4724_v48, %v5742_v15  ;;  %v2456_v51 = vpop.f32.mrb[55].mxu1  ;;  %v3417_v48 = vld [vmem:[%s6213_s3 + $0xc8] sm:$0xff] }
 0x271   : > { %v2525_v43 = vadd.f32 %v2509_v9, %v5902_v28  ;;  %v2457_v35 = vadd.f32 %v5742_v15, %v2456_v51  ;;  %4748 = vmatprep.mubr.msk.f32.mxu0 %vm901_vm2, %v2539_v19  ;;  %v3416_v19 = vld [vmem:[%s6213_s3 + $0xc0] sm:$0xff] }
 0x272   : > { %v2512_v59 = vmax.f32 %v2462_v42, 0.0  ;;  %4749 = vmatmul.mubr.msk.f32.gmra.mrb[66].mxu0 %vm901_vm2, %v2540_v26  ;;  %v2542_v60 = vmul.f32 0.16666667, %v2526_v38  ;;  %v4951_v9 = vpack.c.bf16 %v3416_v19, %v3415_v17  ;;  %v3418_v26 = vld [vmem:[%s6213_s3 + $0xd0] sm:$0xff]  ;;  %v3419_v42 = vld [vmem:[%s6213_s3 + $0xd8] sm:$0xff]  ;;  %v3420_v51 = vld [vmem:[%s6213_s3 + $0xe0] sm:$0xff] }
 0x273   : > { %v2541_v14 = vmul.f32 0.16666667, %v2525_v43  ;;  %v2511_v5 = vmax.f32 %v2457_v35, 0.0  ;;  %v4727_v7 = vpop.f32.mrb[56].mxu1  ;;  %v4955_v38 = vpack.c.bf16 %v3418_v26, %v3417_v48  ;;  %v4959_v43 = vpack.c.bf16 %v3420_v51, %v3419_v42  ;;  %v4162_v35 = vld [vmem:[%s6213_s3 + $0x70] ss:$0 sm:$0xff] }
 0x274   : > { %v2528_v20 = vadd.f32 %v2512_v59, %v5910_v63  ;;  %v2472_v32 = vadd.f32 %v4727_v7, %v5742_v15  ;;  %v2466_v33 = vpop.f32.mrb[57].mxu1  ;;  %v6245_v26 = vld [vmem:[#allocation17_spill] sm:$0xff]  ;;  %v6246_v42 = vld [vmem:[#allocation16_spill] sm:$0xff] }
 0x275   : > { %v2527_v13 = vadd.f32 %v2511_v5, %v5914_v23  ;;  %v2467_v28 = vadd.f32 %v5742_v15, %v2466_v33  ;;  %4751 = vmatprep.mubr.msk.f32.mxu0 %vm901_vm2, %v2541_v14 }
 0x276   : > { %v2514_v27 = vmax.f32 %v2472_v32, 0.0  ;;  %4752 = vmatmul.mubr.msk.f32.gmra.mrb[68].mxu0 %vm901_vm2, %v2542_v60  ;;  %v2544_v4 = vmul.f32 0.16666667, %v2528_v20  ;;  %v3161_v20 = vld [vmem:[%s6213_s3 + $0x98] sm:$0xf] }
 0x277   : > { %v2543_v37 = vmul.f32 0.16666667, %v2527_v13  ;;  %v2513_v50 = vmax.f32 %v2467_v28, 0.0  ;;  %v4730_v16 = vpop.f32.mrb[58].mxu1 }
 0x278   : > { %v2530_v61 = vadd.f32 %v2514_v27, %v5922_v21  ;;  %v2482_v63 = vadd.f32 %v4730_v16, %v5742_v15  ;;  %v2476_v52 = vpop.f32.mrb[59].mxu1 }
 0x279   : > { %v2529_v3 = vadd.f32 %v2513_v50, %v5926_v2  ;;  %v2477_v23 = vadd.f32 %v5742_v15, %v2476_v52  ;;  %4754 = vmatprep.mubr.msk.f32.mxu0 %vm901_vm2, %v2543_v37 }
 0x27a   : > { %v2516_v40 = vmax.f32 %v2482_v63, 0.0  ;;  %4755 = vmatmul.mubr.msk.f32.gmra.mrb[70].mxu0 %vm901_vm2, %v2544_v4  ;;  %v2546_v45 = vmul.f32 0.16666667, %v2530_v61 }
 0x27b   : > { %v2545_v10 = vmul.f32 0.16666667, %v2529_v3  ;;  %v2515_v36 = vmax.f32 %v2477_v23, 0.0  ;;  %v4733_v8 = vpop.f32.mrb[60].mxu1 }
 0x27c   : > { %v2532_v57 = vadd.f32 %v2516_v40, %v5934_v49  ;;  %v2492_v21 = vadd.f32 %v4733_v8, %v5742_v15  ;;  %v2486_v25 = vpop.f32.mrb[61].mxu1 }
 0x27d   : > { %v2531_v30 = vadd.f32 %v2515_v36, %v5938_v39  ;;  %v2487_v2 = vadd.f32 %v5742_v15, %v2486_v25  ;;  %4757 = vmatprep.mubr.msk.f32.mxu0 %vm901_vm2, %v2545_v10 }
 0x27e   : > { %v2518_v46 = vmax.f32 %v2492_v21, 0.0  ;;  %4758 = vmatmul.mubr.msk.f32.gmra.mrb[72].mxu0 %vm901_vm2, %v2546_v45  ;;  %v2548_v12 = vmul.f32 0.16666667, %v2532_v57 }
 0x27f   : > { %v2547_v55 = vmul.f32 0.16666667, %v2531_v30  ;;  %v2517_v1 = vmax.f32 %v2487_v2, 0.0  ;;  %v4736_v11 = vpop.f32.mrb[62].mxu1 }
 0x280   : > { %v2534_v22 = vadd.f32 %v2518_v46, %v5946_v44  ;;  %v2502_v49 = vadd.f32 %v4736_v11, %v5742_v15  ;;  %v2496_v62 = vpop.f32.mrb[63].mxu1  ;;  %v3968_v46 = vld [vmem:[%s6213_s3 + $0x38] ss:$0 sm:$0xff] }
 0x281   : > { %v2533_v24 = vadd.f32 %v2517_v1, %v5948_v29  ;;  %v2497_v39 = vadd.f32 %v5742_v15, %v2496_v62  ;;  %4760 = vmatprep.mubr.msk.f32.mxu0 %vm901_vm2, %v2547_v55  ;;  %v2755_v15 = vld [vmem:[%s6213_s3 + $0x78] sm:$0xff]  ;;  %v1082_v51 = vadd.f32 %v6246_v42, %v3968_v46 }
 0x282   : > { %v2520_v6 = vmax.f32 %v2502_v49, 0.0  ;;  %4761 = vmatmul.mubr.msk.f32.gmra.mrb[74].mxu0 %vm901_vm2, %v2548_v12  ;;  %v2550_v56 = vmul.f32 0.16666667, %v2534_v22  ;;  %v6233_v12 = vld [vmem:[#allocation5_spill] sm:$0xff]  ;;  %v6234_v49 = vld [vmem:[#allocation4_spill] sm:$0xff] }
 0x283   : > { %v2549_v47 = vmul.f32 0.16666667, %v2533_v24  ;;  %v2519_v0 = vmax.f32 %v2497_v39, 0.0  ;;  %v1017_v22 = vadd.f32 %v3968_v46, %v6233_v12  ;;  %v1022_v62 = vadd.f32 %v6234_v49, %v3968_v46  ;;  %v6235_v24 = vld [vmem:[#allocation7_spill] sm:$0xff] }
 0x284   : > { %v2536_v18 = vadd.f32 %v2520_v6, %v5954_v54  ;;  %v2756_v54 = vld [vmem:[%s6213_s3 + $0x80] sm:$0xff]  ;;  %v1027_v39 = vadd.f32 %v3968_v46, %v6235_v24  ;;  %v6236_v6 = vld [vmem:[#allocation6_spill] sm:$0xff] }
 0x285   : > { %v2535_v53 = vadd.f32 %v2519_v0, %v5956_v41  ;;  %4763 = vmatprep.mubr.msk.f32.mxu0 %vm901_vm2, %v2549_v47  ;;  %v4943_v31 = vpack.c.bf16 %v2756_v54, %v2755_v15  ;;  %v3413_v41 = vld [vmem:[%s6213_s3 + $0xa8] sm:$0xff]  ;;  %v1032_v47 = vadd.f32 %v6236_v6, %v3968_v46  ;;  %v6237_v0 = vld [vmem:[#allocation9_spill] sm:$0xff]  ;;  %v6240_v15 = vld [vmem:[#allocation10_spill] sm:$0xff] }
 0x286   : > { %4764 = vmatmul.mubr.msk.f32.gmra.mrb[76].mxu0 %vm901_vm2, %v2550_v56  ;;  %v2552_v29 = vmul.f32 0.16666667, %v2536_v18  ;;  %v4947_v34 = vpack.c.bf16 %v3414_v58, %v3413_v41  ;;  %v1037_v56 = vadd.f32 %v3968_v46, %v6237_v0  ;;  %v6238_v18 = vld [vmem:[#allocation8_spill] sm:$0xff]  ;;  %v1052_v54 = vadd.f32 %v6240_v15, %v3968_v46 }
 0x287   : > { %v2551_v44 = vmul.f32 0.16666667, %v2535_v53  ;;  %4944 = vmatprep.subr.bf16.mxu1 %v4943_v31  ;;  %v1042_v53 = vadd.f32 %v6238_v18, %v3968_v46  ;;  %v6242_v58 = vld [vmem:[#allocation12_spill] sm:$0xff] }
 0x288   : > { %4948 = vmatprep.subr.bf16.mxu0 %v4947_v34  ;;  %v1062_v17 = vadd.f32 %v6242_v58, %v3968_v46 }
 0x289   : > { %4766 = vmatprep.mubr.msk.f32.mxu0 %vm901_vm2, %v2551_v44  ;;  %4950 = vmatpush3.bf16.msra.mxu0 %v4947_v34  ;;  %v6239_v44 = vld [vmem:[#allocation11_spill] sm:$0xff] }
 0x28a   : > { %4767 = vmatmul.mubr.msk.f32.gmra.mrb[78].mxu0 %vm901_vm2, %v2552_v29  ;;  %4952 = vmatprep.subr.bf16.mxu0 %v4951_v9  ;;  %v1047_v29 = vadd.f32 %v3968_v46, %v6239_v44  ;;  %v6243_v34 = vld [vmem:[#allocation15_spill] sm:$0xff] }
 0x28b   : > { %v1067_v19 = vadd.f32 %v3968_v46, %v6243_v34 }
 0x28d   : > { %4954 = vmatpush3.bf16.msra.mxu0 %v4951_v9  ;;  %v6244_v9 = vld [vmem:[#allocation14_spill] sm:$0xff] }
 0x28e   : > { %4956 = vmatprep.subr.bf16.mxu0 %v4955_v38  ;;  %v1072_v48 = vadd.f32 %v6244_v9, %v3968_v46 }
 0x291   : > { %4958 = vmatpush3.bf16.msra.mxu0 %v4955_v38  ;;  %v1077_v38 = vadd.f32 %v3968_v46, %v6245_v26 }
 0x292   : > { %4960 = vmatprep.subr.bf16.mxu0 %v4959_v43 }
 0x295   : > { %4962 = vmatpush3.bf16.msra.mxu0 %v4959_v43  ;;  %v6247_v43 = vld [vmem:[#allocation19_spill] sm:$0xff] }
 0x341   : > { %v4747_v59 = vpop.f32.mrb[64].mxu0 }
 0x342   : > { %v2676_v14 = vpop.f32.mrb[65].mxu0  ;;  %v2682_v7 = vadd.f32 %v4747_v59, %v4162_v35  ;;  %v6248_v59 = vld [vmem:[#allocation18_spill] sm:$0xff] }
 0x343   : > { %v2677_v5 = vadd.f32 %v4162_v35, %v2676_v14  ;;  %v1092_v14 = vadd.f32 %v6248_v59, %v3968_v46 }
 0x345   : > { %v4750_v60 = vpop.f32.mrb[66].mxu0  ;;  %4773 = vmatprep.mubr.msk.f32.mxu1 %vm682_vm0, %v2677_v5  ;;  %v3145_v5 = vld [vmem:[%s6093_s15] sm:$0xff] }
 0x346   : > { %v2686_v32 = vpop.f32.mrb[67].mxu0  ;;  %4774 = vmatmul.mubr.msk.f32.vlgmr.msra.gmra.mrb[64].mxu1 %vm682_vm0, %v2682_v7  ;;  %v2692_v13 = vadd.f32 %v4750_v60, %v4162_v35  ;;  %v3146_v7 = vld [vmem:[%s6093_s15 + $0x8] sm:$0xff]  ;;  %v3147_v60 = vld [vmem:[%s6093_s15 + $0x10] sm:$0xff] }
 0x347   : > { %v2687_v33 = vadd.f32 %v4162_v35, %v2686_v32  ;;  %4946 = vmatpush3.bf16.msra.mxu1 %v4943_v31  ;;  %v6241_v31 = vld [vmem:[#allocation13_spill] sm:$0xff]  ;;  %v3149_v32 = vld [vmem:[%s6093_s15 + $0x20] sm:$0xff] }
 0x348   : > { %4825 = vmatprep.subr.msk.mxu1 %vm3211_vm3, %v3161_v20  ;;  %v1057_v41 = vadd.f32 %v3968_v46, %v6241_v31 }
 0x349   : > { %v4753_v28 = vpop.f32.mrb[68].mxu0  ;;  %4776 = vmatprep.mubr.msk.f32.mxu1 %vm682_vm0, %v2687_v33  ;;  %v3150_v33 = vld [vmem:[%s6093_s15 + $0x28] sm:$0xff] }
 0x34a   : > { %v2696_v27 = vpop.f32.mrb[69].mxu0  ;;  %4777 = vmatmul.mubr.msk.f32.gmra.mrb[66].mxu1 %vm682_vm0, %v2692_v13  ;;  %v2702_v50 = vadd.f32 %v4753_v28, %v4162_v35  ;;  %v3151_v13 = vld [vmem:[%s6093_s15 + $0x30] sm:$0xff]  ;;  %v3152_v28 = vld [vmem:[%s6093_s15 + $0x38] sm:$0xff] }
 0x34b   : > { %v2697_v37 = vadd.f32 %v4162_v35, %v2696_v27  ;;  %v3153_v27 = vld [vmem:[%s6093_s15 + $0x40] sm:$0xff] }
 0x34d   : > { %v4756_v16 = vpop.f32.mrb[70].mxu0  ;;  %4779 = vmatprep.mubr.msk.f32.mxu1 %vm682_vm0, %v2697_v37  ;;  %v3154_v37 = vld [vmem:[%s6093_s15 + $0x48] sm:$0xff] }
 0x34e   : > { %v2706_v4 = vpop.f32.mrb[71].mxu0  ;;  %4780 = vmatmul.mubr.msk.f32.gmra.mrb[68].mxu1 %vm682_vm0, %v2702_v50  ;;  %v2712_v63 = vadd.f32 %v4756_v16, %v4162_v35  ;;  %v3155_v50 = vld [vmem:[%s6093_s15 + $0x50] sm:$0xff]  ;;  %v3156_v16 = vld [vmem:[%s6093_s15 + $0x58] sm:$0xff] }
 0x34f   : > { %v2707_v61 = vadd.f32 %v4162_v35, %v2706_v4  ;;  %v3157_v4 = vld [vmem:[%s6093_s15 + $0x60] sm:$0xff] }
 0x351   : > { %v4759_v52 = vpop.f32.mrb[72].mxu0  ;;  %4782 = vmatprep.mubr.msk.f32.mxu1 %vm682_vm0, %v2707_v61  ;;  %v3158_v61 = vld [vmem:[%s6093_s15 + $0x68] sm:$0xff] }
 0x352   : > { %v2716_v3 = vpop.f32.mrb[73].mxu0  ;;  %4783 = vmatmul.mubr.msk.f32.gmra.mrb[70].mxu1 %vm682_vm0, %v2712_v63  ;;  %v2722_v40 = vadd.f32 %v4759_v52, %v4162_v35  ;;  %v3159_v63 = vld [vmem:[%s6093_s15 + $0x70] sm:$0xff]  ;;  %v3160_v52 = vld [vmem:[%s6093_s15 + $0x78] sm:$0xff] }
 0x353   : > { %v2717_v23 = vadd.f32 %v4162_v35, %v2716_v3  ;;  %v3636_v3 = vld [vmem:[%s6213_s3 + $0xf0] sm:$0xff] }
 0x355   : > { %v4762_v10 = vpop.f32.mrb[74].mxu0  ;;  %4785 = vmatprep.mubr.msk.f32.mxu1 %vm682_vm0, %v2717_v23  ;;  %v3637_v23 = vld [vmem:[%s6213_s3 + $0xf8] sm:$0xff] }
 0x356   : > { %v2726_v36 = vpop.f32.mrb[75].mxu0  ;;  %4786 = vmatmul.mubr.msk.f32.gmra.mrb[72].mxu1 %vm682_vm0, %v2722_v40  ;;  %v2732_v45 = vadd.f32 %v4762_v10, %v4162_v35  ;;  %v4963_v40 = vpack.c.bf16 %v3637_v23, %v3636_v3  ;;  %v4228_v10 = vld [vmem:[%s6213_s3 + $0xa0] ss:$0 sm:$0xff] }
 0x357   : > { %v2727_v8 = vadd.f32 %v4162_v35, %v2726_v36 }
 0x358   : > { %4964 = vmatprep.subr.bf16.mxu0 %v4963_v40 }
 0x359   : > { %v4765_v57 = vpop.f32.mrb[76].mxu0  ;;  %4788 = vmatprep.mubr.msk.f32.mxu1 %vm682_vm0, %v2727_v8 }
 0x35a   : > { %v2736_v21 = vpop.f32.mrb[77].mxu0  ;;  %4789 = vmatmul.mubr.msk.f32.gmra.mrb[74].mxu1 %vm682_vm0, %v2732_v45  ;;  %v2742_v30 = vadd.f32 %v4765_v57, %v4162_v35 }
 0x35b   : > { %v2737_v25 = vadd.f32 %v4162_v35, %v2736_v21 }
 0x35d   : > { %v4768_v2 = vpop.f32.mrb[78].mxu0  ;;  %4791 = vmatprep.mubr.msk.f32.mxu1 %vm682_vm0, %v2737_v25 }
 0x35e   : > { %v2746_v55 = vpop.f32.mrb[79].mxu0  ;;  %4792 = vmatmul.mubr.msk.f32.gmra.mrb[76].mxu1 %vm682_vm0, %v2742_v30  ;;  %v2752_v11 = vadd.f32 %v4768_v2, %v4162_v35 }
 0x35f   : > { %v2747_v1 = vadd.f32 %v4162_v35, %v2746_v55  ;;  %v1087_v35 = vadd.f32 %v3968_v46, %v6247_v43 }
 0x361   : > { %4794 = vmatprep.mubr.msk.f32.mxu1 %vm682_vm0, %v2747_v1 }
 0x362   : > { %4795 = vmatmul.mubr.msk.f32.gmra.mrb[78].mxu1 %vm682_vm0, %v2752_v11 }
 0x363   : > { %4801 = vmatprep.mubr.msk.f32.mxu1 %vm682_vm0, %v1017_v22 }
 0x366   : > { %4802 = vmatmul.mubr.msk.f32.vlgmr.msra.gmra.mrb[64].mxu1 %vm682_vm0, %v1022_v62 }
 0x367   : > { %4826 = vmatpush3.msk.msra.mxu1 %vm3211_vm3, %v3161_v20  ;;  %4804 = vmatprep.mubr.msk.f32.mxu1 %vm682_vm0, %v1027_v39  ;;  %v3148_v20 = vld [vmem:[%s6093_s15 + $0x18] sm:$0xff] }
 0x36a   : > { %4805 = vmatmul.mubr.msk.f32.gmra.mrb[66].mxu1 %vm682_vm0, %v1032_v47 }
 0x36b   : > { %4807 = vmatprep.mubr.msk.f32.mxu1 %vm682_vm0, %v1037_v56 }
 0x36e   : > { %4808 = vmatmul.mubr.msk.f32.gmra.mrb[68].mxu1 %vm682_vm0, %v1042_v53 }
 0x36f   : > { %4810 = vmatprep.mubr.msk.f32.mxu1 %vm682_vm0, %v1047_v29 }
 0x372   : > { %4811 = vmatmul.mubr.msk.f32.gmra.mrb[70].mxu1 %vm682_vm0, %v1052_v54 }
 0x373   : > { %4813 = vmatprep.mubr.msk.f32.mxu1 %vm682_vm0, %v1057_v41 }
 0x376   : > { %4814 = vmatmul.mubr.msk.f32.gmra.mrb[72].mxu1 %vm682_vm0, %v1062_v17 }
 0x377   : > { %4816 = vmatprep.mubr.msk.f32.mxu1 %vm682_vm0, %v1067_v19 }
 0x37a   : > { %4817 = vmatmul.mubr.msk.f32.gmra.mrb[74].mxu1 %vm682_vm0, %v1072_v48 }
 0x37b   : > { %4819 = vmatprep.mubr.msk.f32.mxu1 %vm682_vm0, %v1077_v38 }
 0x37e   : > { %4820 = vmatmul.mubr.msk.f32.gmra.mrb[76].mxu1 %vm682_vm0, %v1082_v51 }
 0x37f   : > { %4822 = vmatprep.mubr.msk.f32.mxu1 %vm682_vm0, %v1087_v35 }
 0x382   : > { %4823 = vmatmul.mubr.msk.f32.gmra.mrb[78].mxu1 %vm682_vm0, %v1092_v14 }
 0x383   : > { %4827 = vmatprep.mubr.msk.f32.mxu1 %vm3162_vm4, %v3145_v5 }
 0x386   : > { %4828 = vmatmul.mubr.msk.f32.vlgmr.msra.gmra.mrb[64].mxu1 %vm3162_vm4, %v3146_v7 }
 0x387   : > { %4830 = vmatprep.mubr.msk.f32.mxu1 %vm3162_vm4, %v3147_v60 }
 0x38a   : > { %4831 = vmatmul.mubr.msk.f32.gmra.mrb[66].mxu1 %vm3162_vm4, %v3148_v20 }
 0x38b   : > { %4833 = vmatprep.mubr.msk.f32.mxu1 %vm3162_vm4, %v3149_v32  ;;  %v4229_v32 = vld [vmem:[%s6213_s3 + $0xe8] ss:$0 sm:$0xff] }
 0x38e   : > { %4834 = vmatmul.mubr.msk.f32.gmra.mrb[68].mxu1 %vm3162_vm4, %v3150_v33 }
 0x38f   : > { %4836 = vmatprep.mubr.msk.f32.mxu1 %vm3162_vm4, %v3151_v13 }
 0x392   : > { %4837 = vmatmul.mubr.msk.f32.gmra.mrb[70].mxu1 %vm3162_vm4, %v3152_v28 }
 0x393   : > { %4839 = vmatprep.mubr.msk.f32.mxu1 %vm3162_vm4, %v3153_v27 }
 0x396   : > { %4840 = vmatmul.mubr.msk.f32.gmra.mrb[72].mxu1 %vm3162_vm4, %v3154_v37 }
 0x397   : > { %4842 = vmatprep.mubr.msk.f32.mxu1 %vm3162_vm4, %v3155_v50 }
 0x39a   : > { %4843 = vmatmul.mubr.msk.f32.gmra.mrb[74].mxu1 %vm3162_vm4, %v3156_v16 }
 0x39b   : > { %4845 = vmatprep.mubr.msk.f32.mxu1 %vm3162_vm4, %v3157_v4 }
 0x39e   : > { %4846 = vmatmul.mubr.msk.f32.gmra.mrb[76].mxu1 %vm3162_vm4, %v3158_v61 }
 0x39f   : > { %4848 = vmatprep.mubr.msk.f32.mxu1 %vm3162_vm4, %v3159_v63 }
 0x3a2   : > { %4849 = vmatmul.mubr.msk.f32.gmra.mrb[78].mxu1 %vm3162_vm4, %v3160_v52 }
 0x459   : > { %v4829_v36 = vpop.f32.mrb[64].mxu1 }
 0x45a   : > { %v3382_v8 = vadd.f32 %v4829_v36, %v4228_v10  ;;  %v3281_v45 = vpop.f32.mrb[65].mxu1 }
 0x45b   : > { %v3381_v57 = vadd.f32 %v4228_v10, %v3281_v45 }
 0x45c   : > { %v3398_v30 = vmax.f32 %v3382_v8, 0.0 }
 0x45d   : > { %v3397_v21 = vmax.f32 %v3381_v57, 0.0  ;;  %v4832_v25 = vpop.f32.mrb[66].mxu1 }
 0x45e   : > { %v3384_v2 = vadd.f32 %v4832_v25, %v4228_v10  ;;  %v3291_v46 = vpop.f32.mrb[67].mxu1 }
 0x45f   : > { %v3383_v55 = vadd.f32 %v4228_v10, %v3291_v46  ;;  %4867 = vmatprep.mubr.msk.f32.mxu0 %vm3426_vm5, %v3397_v21 }
 0x460   : > { %4868 = vmatmul.mubr.msk.f32.vlgmr.msra.gmra.mrb[80].mxu0 %vm3426_vm5, %v3398_v30  ;;  %v3400_v12 = vmax.f32 %v3384_v2, 0.0 }
 0x461   : > { %v3399_v1 = vmax.f32 %v3383_v55, 0.0  ;;  %v4835_v11 = vpop.f32.mrb[68].mxu1  ;;  %4966 = vmatpush3.bf16.msra.mxu0 %v4963_v40 }
 0x462   : > { %v3386_v22 = vadd.f32 %v4835_v11, %v4228_v10  ;;  %v3301_v49 = vpop.f32.mrb[69].mxu1 }
 0x463   : > { %v3385_v62 = vadd.f32 %v4228_v10, %v3301_v49  ;;  %4870 = vmatprep.mubr.msk.f32.mxu0 %vm3426_vm5, %v3399_v1 }
 0x464   : > { %4871 = vmatmul.mubr.msk.f32.gmra.mrb[82].mxu0 %vm3426_vm5, %v3400_v12  ;;  %v3402_v6 = vmax.f32 %v3386_v22, 0.0 }
 0x465   : > { %v3401_v24 = vmax.f32 %v3385_v62, 0.0  ;;  %v4838_v39 = vpop.f32.mrb[70].mxu1 }
 0x466   : > { %v3388_v47 = vadd.f32 %v4838_v39, %v4228_v10  ;;  %v3311_v0 = vpop.f32.mrb[71].mxu1 }
 0x467   : > { %v3387_v56 = vadd.f32 %v4228_v10, %v3311_v0  ;;  %4873 = vmatprep.mubr.msk.f32.mxu0 %vm3426_vm5, %v3401_v24 }
 0x468   : > { %4874 = vmatmul.mubr.msk.f32.gmra.mrb[84].mxu0 %vm3426_vm5, %v3402_v6  ;;  %v3404_v44 = vmax.f32 %v3388_v47, 0.0 }
 0x469   : > { %v3403_v18 = vmax.f32 %v3387_v56, 0.0  ;;  %v4841_v53 = vpop.f32.mrb[72].mxu1 }
 0x46a   : > { %v3390_v29 = vadd.f32 %v4841_v53, %v4228_v10  ;;  %v3321_v15 = vpop.f32.mrb[73].mxu1 }
 0x46b   : > { %v3389_v54 = vadd.f32 %v4228_v10, %v3321_v15  ;;  %4876 = vmatprep.mubr.msk.f32.mxu0 %vm3426_vm5, %v3403_v18 }
 0x46c   : > { %4877 = vmatmul.mubr.msk.f32.gmra.mrb[86].mxu0 %vm3426_vm5, %v3404_v44  ;;  %v3406_v58 = vmax.f32 %v3390_v29, 0.0 }
 0x46d   : > { %v3405_v31 = vmax.f32 %v3389_v54, 0.0  ;;  %v4844_v41 = vpop.f32.mrb[74].mxu1 }
 0x46e   : > { %v3392_v17 = vadd.f32 %v4844_v41, %v4228_v10  ;;  %v3331_v34 = vpop.f32.mrb[75].mxu1 }
 0x46f   : > { %v3391_v19 = vadd.f32 %v4228_v10, %v3331_v34  ;;  %4879 = vmatprep.mubr.msk.f32.mxu0 %vm3426_vm5, %v3405_v31 }
 0x470   : > { %4880 = vmatmul.mubr.msk.f32.gmra.mrb[88].mxu0 %vm3426_vm5, %v3406_v58  ;;  %v3408_v26 = vmax.f32 %v3392_v17, 0.0 }
 0x471   : > { %v3407_v9 = vmax.f32 %v3391_v19, 0.0  ;;  %v4847_v48 = vpop.f32.mrb[76].mxu1  ;;  %v4246_v19 = vld [vmem:[%s6213_s3 + $0x100] ss:$0 sm:$0xff] }
 0x472   : > { %v3394_v38 = vadd.f32 %v4847_v48, %v4228_v10  ;;  %v3341_v42 = vpop.f32.mrb[77].mxu1 }
 0x473   : > { %v3393_v51 = vadd.f32 %v4228_v10, %v3341_v42  ;;  %4882 = vmatprep.mubr.msk.f32.mxu0 %vm3426_vm5, %v3407_v9 }
 0x474   : > { %4883 = vmatmul.mubr.msk.f32.gmra.mrb[90].mxu0 %vm3426_vm5, %v3408_v26  ;;  %v3410_v59 = vmax.f32 %v3394_v38, 0.0 }
 0x475   : > { %v3409_v43 = vmax.f32 %v3393_v51, 0.0  ;;  %v4850_v35 = vpop.f32.mrb[78].mxu1 }
 0x476   : > { %v3396_v14 = vadd.f32 %v4850_v35, %v4228_v10  ;;  %v3351_v5 = vpop.f32.mrb[79].mxu1 }
 0x477   : > { %v3395_v7 = vadd.f32 %v4228_v10, %v3351_v5  ;;  %4885 = vmatprep.mubr.msk.f32.mxu0 %vm3426_vm5, %v3409_v43 }
 0x478   : > { %4886 = vmatmul.mubr.msk.f32.gmra.mrb[92].mxu0 %vm3426_vm5, %v3410_v59  ;;  %v3412_v20 = vmax.f32 %v3396_v14, 0.0 }
 0x479   : > { %v3411_v60 = vmax.f32 %v3395_v7, 0.0 }
 0x47b   : > { %4888 = vmatprep.mubr.msk.f32.mxu0 %vm3426_vm5, %v3411_v60 }
 0x47c   : > { %4889 = vmatmul.mubr.msk.f32.gmra.mrb[94].mxu0 %vm3426_vm5, %v3412_v20 }
 0x533   : > { %v4869_v33 = vpop.f32.mrb[80].mxu0 }
 0x534   : > { %v3547_v13 = vadd.f32 %v4869_v33, %v4229_v32  ;;  %v3541_v28 = vpop.f32.mrb[81].mxu0 }
 0x535   : > { %v3542_v27 = vadd.f32 %v4229_v32, %v3541_v28 }
 0x536   : > { %v3621_v16 = vmax.f32 %v3547_v13, 0.0 }
 0x537   : > { %v3620_v37 = vmax.f32 %v3542_v27, 0.0  ;;  %v4872_v50 = vpop.f32.mrb[82].mxu0 }
 0x538   : > { %v3557_v4 = vadd.f32 %v4872_v50, %v4229_v32  ;;  %v3551_v61 = vpop.f32.mrb[83].mxu0 }
 0x539   : > { %v3552_v63 = vadd.f32 %v4229_v32, %v3551_v61  ;;  %4895 = vmatprep.mubr.msk.f32.mxu0 %vm682_vm0, %v3620_v37 }
 0x53a   : > { %4896 = vmatmul.mubr.msk.f32.vlgmr.msra.gmra.mrb[96].mxu0 %vm682_vm0, %v3621_v16  ;;  %v3623_v23 = vmax.f32 %v3557_v4, 0.0 }
 0x53b   : > { %v3622_v52 = vmax.f32 %v3552_v63, 0.0  ;;  %v4875_v3 = vpop.f32.mrb[84].mxu0 }
 0x53c   : > { %v3567_v40 = vadd.f32 %v4875_v3, %v4229_v32  ;;  %v3561_v10 = vpop.f32.mrb[85].mxu0 }
 0x53d   : > { %v3562_v36 = vadd.f32 %v4229_v32, %v3561_v10  ;;  %4898 = vmatprep.mubr.msk.f32.mxu0 %vm682_vm0, %v3622_v52 }
 0x53e   : > { %4899 = vmatmul.mubr.msk.f32.gmra.mrb[98].mxu0 %vm682_vm0, %v3623_v23  ;;  %v3625_v57 = vmax.f32 %v3567_v40, 0.0 }
 0x53f   : > { %v3624_v8 = vmax.f32 %v3562_v36, 0.0  ;;  %v4878_v45 = vpop.f32.mrb[86].mxu0 }
 0x540   : > { %v3577_v21 = vadd.f32 %v4878_v45, %v4229_v32  ;;  %v3571_v25 = vpop.f32.mrb[87].mxu0 }
 0x541   : > { %v3572_v30 = vadd.f32 %v4229_v32, %v3571_v25  ;;  %4901 = vmatprep.mubr.msk.f32.mxu0 %vm682_vm0, %v3624_v8 }
 0x542   : > { %4902 = vmatmul.mubr.msk.f32.gmra.mrb[100].mxu0 %vm682_vm0, %v3625_v57  ;;  %v3627_v55 = vmax.f32 %v3577_v21, 0.0 }
 0x543   : > { %v3626_v2 = vmax.f32 %v3572_v30, 0.0  ;;  %v4881_v46 = vpop.f32.mrb[88].mxu0 }
 0x544   : > { %v3587_v1 = vadd.f32 %v4881_v46, %v4229_v32  ;;  %v3581_v11 = vpop.f32.mrb[89].mxu0 }
 0x545   : > { %v3582_v12 = vadd.f32 %v4229_v32, %v3581_v11  ;;  %4904 = vmatprep.mubr.msk.f32.mxu0 %vm682_vm0, %v3626_v2 }
 0x546   : > { %4905 = vmatmul.mubr.msk.f32.gmra.mrb[102].mxu0 %vm682_vm0, %v3627_v55  ;;  %v3629_v62 = vmax.f32 %v3587_v1, 0.0 }
 0x547   : > { %v3628_v22 = vmax.f32 %v3582_v12, 0.0  ;;  %v4884_v49 = vpop.f32.mrb[90].mxu0 }
 0x548   : > { %v3597_v24 = vadd.f32 %v4884_v49, %v4229_v32  ;;  %v3591_v39 = vpop.f32.mrb[91].mxu0 }
 0x549   : > { %v3592_v6 = vadd.f32 %v4229_v32, %v3591_v39  ;;  %4907 = vmatprep.mubr.msk.f32.mxu0 %vm682_vm0, %v3628_v22 }
 0x54a   : > { %4908 = vmatmul.mubr.msk.f32.gmra.mrb[104].mxu0 %vm682_vm0, %v3629_v62  ;;  %v3631_v56 = vmax.f32 %v3597_v24, 0.0 }
 0x54b   : > { %v3630_v47 = vmax.f32 %v3592_v6, 0.0  ;;  %v4887_v0 = vpop.f32.mrb[92].mxu0 }
 0x54c   : > { %v3607_v18 = vadd.f32 %v4887_v0, %v4229_v32  ;;  %v3601_v53 = vpop.f32.mrb[93].mxu0 }
 0x54d   : > { %v3602_v44 = vadd.f32 %v4229_v32, %v3601_v53  ;;  %4910 = vmatprep.mubr.msk.f32.mxu0 %vm682_vm0, %v3630_v47 }
 0x54e   : > { %4911 = vmatmul.mubr.msk.f32.gmra.mrb[106].mxu0 %vm682_vm0, %v3631_v56  ;;  %v3633_v54 = vmax.f32 %v3607_v18, 0.0 }
 0x54f   : > { %v3632_v29 = vmax.f32 %v3602_v44, 0.0  ;;  %v4890_v15 = vpop.f32.mrb[94].mxu0 }
 0x550   : > { %v3617_v31 = vadd.f32 %v4890_v15, %v4229_v32  ;;  %v3611_v41 = vpop.f32.mrb[95].mxu0 }
 0x551   : > { %v3612_v58 = vadd.f32 %v4229_v32, %v3611_v41  ;;  %4913 = vmatprep.mubr.msk.f32.mxu0 %vm682_vm0, %v3632_v29 }
 0x552   : > { %4914 = vmatmul.mubr.msk.f32.gmra.mrb[108].mxu0 %vm682_vm0, %v3633_v54  ;;  %v3635_v34 = vmax.f32 %v3617_v31, 0.0 }
 0x553   : > { %v3634_v17 = vmax.f32 %v3612_v58, 0.0 }
 0x555   : > { %4916 = vmatprep.mubr.msk.f32.mxu0 %vm682_vm0, %v3634_v17 }
 0x556   : > { %4917 = vmatmul.mubr.msk.f32.gmra.mrb[110].mxu0 %vm682_vm0, %v3635_v34 }
 0x60d   : > { %v4897_v9 = vpop.f32.mrb[96].mxu0 }
 0x60e   : > { %v3763_v48 = vadd.f32 %v4897_v9, %v4246_v19  ;;  %v3757_v26 = vpop.f32.mrb[97].mxu0 }
 0x60f   : > { %v3758_v38 = vadd.f32 %v4246_v19, %v3757_v26 }
 0x610   : > { %3837 = vst [vmem:[%s6182_s20 + $0x8] sm:$0xff] %v3763_v48 }
 0x611   : > { %3836 = vst [vmem:[%s6182_s20] sm:$0xff] %v3758_v38  ;;  %v4900_v42 = vpop.f32.mrb[98].mxu0 }
 0x612   : > { %v3773_v51 = vadd.f32 %v4900_v42, %v4246_v19  ;;  %v3767_v43 = vpop.f32.mrb[99].mxu0 }
 0x613   : > { %v3768_v35 = vadd.f32 %v4246_v19, %v3767_v43 }
 0x614   : > { %3839 = vst [vmem:[%s6182_s20 + $0x18] sm:$0xff] %v3773_v51 }
 0x615   : > { %3838 = vst [vmem:[%s6182_s20 + $0x10] sm:$0xff] %v3768_v35  ;;  %v4903_v59 = vpop.f32.mrb[100].mxu0 }
 0x616   : > { %v3783_v14 = vadd.f32 %v4903_v59, %v4246_v19  ;;  %v3777_v5 = vpop.f32.mrb[101].mxu0 }
 0x617   : > { %v3778_v7 = vadd.f32 %v4246_v19, %v3777_v5 }
 0x618   : > { %3841 = vst [vmem:[%s6182_s20 + $0x28] sm:$0xff] %v3783_v14 }
 0x619   : > { %3840 = vst [vmem:[%s6182_s20 + $0x20] sm:$0xff] %v3778_v7  ;;  %v4906_v60 = vpop.f32.mrb[102].mxu0 }
 0x61a   : > { %v3793_v20 = vadd.f32 %v4906_v60, %v4246_v19  ;;  %v3787_v32 = vpop.f32.mrb[103].mxu0 }
 0x61b   : > { %v3788_v33 = vadd.f32 %v4246_v19, %v3787_v32 }
 0x61c   : > { %3843 = vst [vmem:[%s6182_s20 + $0x38] sm:$0xff] %v3793_v20 }
 0x61d   : > { %3842 = vst [vmem:[%s6182_s20 + $0x30] sm:$0xff] %v3788_v33  ;;  %v4909_v13 = vpop.f32.mrb[104].mxu0 }
 0x61e   : > { %v3803_v28 = vadd.f32 %v4909_v13, %v4246_v19  ;;  %v3797_v27 = vpop.f32.mrb[105].mxu0 }
 0x61f   : > { %v3798_v37 = vadd.f32 %v4246_v19, %v3797_v27 }
 0x620   : > { %3845 = vst [vmem:[%s6182_s20 + $0x48] sm:$0xff] %v3803_v28 }
 0x621   : > { %3844 = vst [vmem:[%s6182_s20 + $0x40] sm:$0xff] %v3798_v37  ;;  %v4912_v50 = vpop.f32.mrb[106].mxu0 }
 0x622   : > { %v3813_v16 = vadd.f32 %v4912_v50, %v4246_v19  ;;  %v3807_v4 = vpop.f32.mrb[107].mxu0 }
 0x623   : > { %v3808_v61 = vadd.f32 %v4246_v19, %v3807_v4 }
 0x624   : > { %3847 = vst [vmem:[%s6182_s20 + $0x58] sm:$0xff] %v3813_v16 }
 0x625   : > { %3846 = vst [vmem:[%s6182_s20 + $0x50] sm:$0xff] %v3808_v61  ;;  %v4915_v63 = vpop.f32.mrb[108].mxu0 }
 0x626   : > { %v3823_v52 = vadd.f32 %v4915_v63, %v4246_v19  ;;  %v3817_v3 = vpop.f32.mrb[109].mxu0 }
 0x627   : > { %v3818_v23 = vadd.f32 %v4246_v19, %v3817_v3 }
 0x628   : > { %3849 = vst [vmem:[%s6182_s20 + $0x68] sm:$0xff] %v3823_v52 }
 0x629   : > { %3848 = vst [vmem:[%s6182_s20 + $0x60] sm:$0xff] %v3818_v23  ;;  %v4918_v40 = vpop.f32.mrb[110].mxu0 }
 0x62a   : > { %v3833_v10 = vadd.f32 %v4918_v40, %v4246_v19  ;;  %v3827_v36 = vpop.f32.mrb[111].mxu0 }
 0x62b   : > { %v3828_v8 = vadd.f32 %v4246_v19, %v3827_v36 }
 0x62c   : > { %3851 = vst [vmem:[%s6182_s20 + $0x78] sm:$0xff] %v3833_v10 }
 0x62d   : > { %3850 = vst [vmem:[%s6182_s20 + $0x70] sm:$0xff] %v3828_v8 }
 0x62e PF: > { %p11_p9 = scmp.ge.s32.totalorder %s5091_s19, 4   ;;  %s6249_s15 = smov %s5043_s16 }
 0x62f   : > { %s6250_s16 = smov %s5100_s22  ;;  %s6251_s17 = smov %s5091_s19 }
 0x630   :  { %13 = sbr.rel (!%p11_p9) target bundleno = 2 (0x2), region = 120 }

</bundles_post_ra>
